<compile_context>
chip_gen: v6e
topology: v6e:2x2x1
jax: 0.10.0
libtpu: 0.0.40
codegen_flags: <defaults>
</compile_context>

<pallas_src>
import functools

import jax
import jax.numpy as jnp
import numpy as np
from jax import lax
from jax.experimental import pallas as pl
from jax.experimental.pallas import tpu as pltpu

LANE = 128


def lstm_kernel(x_ref, wih_ref, whh_ref, b_ref, wfc_ref, bfc_ref,
                out_ref, gx_ref, hs_ref, *, seq_len, batch):
    """Single-invocation LSTM recurrence + FC head.

    x_ref   : (T*B, I)          all timesteps' inputs
    wih_ref : (I,  4*Hp)        gate-padded W_ih^T
    whh_ref : (Hp, 4*Hp)        gate-padded W_hh^T
    b_ref   : (1,  4*Hp) f32    b_ih + b_hh (gate-padded)
    wfc_ref : (Hp, O)           W_fc^T
    bfc_ref : (1,  O)    f32    b_fc
    out_ref : (T*B, O)
    gx_ref  : (T*B, 4*Hp) f32   scratch: precomputed input-gate projections
    hs_ref  : (T*B, Hp)   f32   scratch: all hidden states
    """
    hp = whh_ref.shape[0]
    w_dtype = whh_ref.dtype

    # ---- Phase 1: input projection for every timestep as ONE matmul (M = T*B),
    # bias folded in once (not per step). ----
    gx_ref[...] = (
        jnp.dot(x_ref[...].astype(w_dtype), wih_ref[...],
                preferred_element_type=jnp.float32)
        + b_ref[...])

    # ---- Phase 2: serial recurrence. Only h_prev @ W_hh^T per step; W_hh is
    # loaded once (loop-invariant). T is small & static so the loop is fully
    # unrolled -> every slice offset below is static and the scheduler sees the
    # whole chain. (For very long T switch to lax.fori_loop to bound code size.)
    whh = whh_ref[...]
    h = jnp.zeros((batch, hp), jnp.float32)
    c = jnp.zeros((batch, hp), jnp.float32)
    for t in range(seq_len):
        row = pl.ds(t * batch, batch)
        gates = (jnp.dot(h.astype(w_dtype), whh,
                         preferred_element_type=jnp.float32)
                 + gx_ref[row, :])
        # PyTorch gate order i, f, g, o; each slice is a whole 128-lane tile.
        i_g = jax.nn.sigmoid(gates[:, 0 * hp:1 * hp])
        f_g = jax.nn.sigmoid(gates[:, 1 * hp:2 * hp])
        g_g = jnp.tanh(gates[:, 2 * hp:3 * hp])
        o_g = jax.nn.sigmoid(gates[:, 3 * hp:4 * hp])
        c = f_g * c + i_g * g_g
        h = o_g * jnp.tanh(c)
        hs_ref[row, :] = h

    # ---- Phase 3: FC head over ALL hidden states as one matmul + one store. ----
    y = (jnp.dot(hs_ref[...].astype(w_dtype), wfc_ref[...],
                 preferred_element_type=jnp.float32)
         + bfc_ref[...])
    out_ref[...] = y.astype(out_ref.dtype)


def _pad_gate_weight(w, hidden, hidden_pad):
    """(4H, K) PyTorch gate-stacked weights -> (K, 4*Hp), each gate lane-aligned."""
    k = w.shape[1]
    w4 = w.reshape(4, hidden, k)
    w4 = jnp.pad(w4, ((0, 0), (0, hidden_pad - hidden), (0, 0)))
    return jnp.transpose(w4, (2, 0, 1)).reshape(k, 4 * hidden_pad)


def lstm_forward(x, w_ih, w_hh, b_ih, b_hh, w_fc, b_fc, *,
                 weight_dtype=jnp.float32):
    """x: (T, B, I) float32. Returns (T, B, O) float32.

    weight_dtype=jnp.bfloat16 is recommended on v6e/v7x (full-rate MXU, half the
    resident weight VMEM); accumulation + elementwise math always stay float32.
    """
    seq, batch, n_in = x.shape
    hidden = w_hh.shape[1]
    n_out = w_fc.shape[0]
    hp = ((hidden + LANE - 1) // LANE) * LANE       # lane-aligned hidden size
    g = 4 * hp

    wih_t = _pad_gate_weight(jnp.asarray(w_ih, jnp.float32), hidden, hp)      # (I, 4Hp)
    whh_t = _pad_gate_weight(jnp.asarray(w_hh, jnp.float32), hidden, hp)      # (H, 4Hp)
    whh_t = jnp.pad(whh_t, ((0, hp - hidden), (0, 0)))                        # (Hp, 4Hp)
    bias = jnp.pad((b_ih + b_hh).astype(jnp.float32).reshape(4, hidden),
                   ((0, 0), (0, hp - hidden))).reshape(1, g)                  # (1, 4Hp)
    wfc_t = jnp.pad(jnp.asarray(w_fc, jnp.float32).T,
                    ((0, hp - hidden), (0, 0)))                               # (Hp, O)
    bfc = jnp.asarray(b_fc, jnp.float32).reshape(1, n_out)                    # (1, O)

    wih_t = wih_t.astype(weight_dtype)
    whh_t = whh_t.astype(weight_dtype)
    wfc_t = wfc_t.astype(weight_dtype)

    x2 = jnp.asarray(x, jnp.float32).reshape(seq * batch, n_in)

    kernel = functools.partial(lstm_kernel, seq_len=seq, batch=batch)

    out2 = pl.pallas_call(
        kernel,
        out_shape=jax.ShapeDtypeStruct((seq * batch, n_out), jnp.float32),
        grid=(1,),
        in_specs=[
            pl.BlockSpec((seq * batch, n_in), lambda i: (0, 0)),   # x (all steps)
            pl.BlockSpec((n_in, g), lambda i: (0, 0)),             # W_ih^T
            pl.BlockSpec((hp, g), lambda i: (0, 0)),               # W_hh^T
            pl.BlockSpec((1, g), lambda i: (0, 0)),                # bias
            pl.BlockSpec((hp, n_out), lambda i: (0, 0)),           # W_fc^T
            pl.BlockSpec((1, n_out), lambda i: (0, 0)),            # b_fc
        ],
        out_specs=pl.BlockSpec((seq * batch, n_out), lambda i: (0, 0)),
        scratch_shapes=[
            pltpu.VMEM((seq * batch, g), jnp.float32),     # gates_x for all steps
            pltpu.VMEM((seq * batch, hp), jnp.float32),    # all hidden states
        ],
        compiler_params=pltpu.CompilerParams(
            # Sequence axis is recurrent; at production batch sizes a leading
            # batch-shard axis could be added as "parallel" for v7x's 2 TCs.
            dimension_semantics=("arbitrary",),
            vmem_limit_bytes=32 * 1024 * 1024,
        ),
    )(x2, wih_t, whh_t, bias, wfc_t, bfc)

    return out2.reshape(seq, batch, n_out)


def lstm_reference(x, w_ih, w_hh, b_ih, b_hh, w_fc, b_fc):
    """Pure-JAX float32 reference of the same forward pass."""
    T, B, I = x.shape
    H = w_hh.shape[1]

    def step(carry, x_t):
        h, c = carry
        gates = x_t @ w_ih.T + h @ w_hh.T + b_ih + b_hh
        i_g = jax.nn.sigmoid(gates[:, 0 * H:1 * H])
        f_g = jax.nn.sigmoid(gates[:, 1 * H:2 * H])
        g_g = jnp.tanh(gates[:, 2 * H:3 * H])
        o_g = jax.nn.sigmoid(gates[:, 3 * H:4 * H])
        c = f_g * c + i_g * g_g
        h = o_g * jnp.tanh(c)
        return (h, c), h

    h0 = jnp.zeros((B, H), jnp.float32)
    c0 = jnp.zeros((B, H), jnp.float32)
    _, hs = lax.scan(step, (h0, c0), x)            # (T, B, H)
    return hs @ w_fc.T + b_fc                      # (T, B, O)


if __name__ == "__main__":
    # seq == batch so the original PyTorch forward (which builds H/C from
    # x.shape[0]) is well-defined.
    T, B = 8, 8
    num_inputs, num_hiddens, num_outputs = 16, 32, 10

    key = jax.random.PRNGKey(0)
    ks = jax.random.split(key, 7)
    scale = 1.0 / np.sqrt(num_hiddens)

    x = jax.random.normal(ks[0], (T, B, num_inputs), jnp.float32)
    w_ih = jax.random.uniform(ks[1], (4 * num_hiddens, num_inputs),
                              jnp.float32, -scale, scale)
    w_hh = jax.random.uniform(ks[2], (4 * num_hiddens, num_hiddens),
                              jnp.float32, -scale, scale)
    b_ih = jax.random.uniform(ks[3], (4 * num_hiddens,), jnp.float32, -scale, scale)
    b_hh = jax.random.uniform(ks[4], (4 * num_hiddens,), jnp.float32, -scale, scale)
    w_fc = jax.random.uniform(ks[5], (num_outputs, num_hiddens),
                              jnp.float32, -scale, scale)
    b_fc = jax.random.uniform(ks[6], (num_outputs,), jnp.float32, -scale, scale)

    ref = jax.block_until_ready(
        lstm_reference(x, w_ih, w_hh, b_ih, b_hh, w_fc, b_fc))

    # f32 weights: exact-ish match to the PyTorch-equivalent reference.
    out = jax.block_until_ready(
        lstm_forward(x, w_ih, w_hh, b_ih, b_hh, w_fc, b_fc))
    assert out.shape == (T, B, num_outputs), out.shape
    np.testing.assert_allclose(np.asarray(out), np.asarray(ref),
                               rtol=1e-4, atol=1e-4)

    # bf16 MXU weights (v6e/v7x recommendation); f32 accumulation & elementwise.
    out_bf16 = jax.block_until_ready(
        lstm_forward(x, w_ih, w_hh, b_ih, b_hh, w_fc, b_fc,
                     weight_dtype=jnp.bfloat16))
    np.testing.assert_allclose(np.asarray(out_bf16), np.asarray(ref),
                               rtol=5e-2, atol=5e-2)

    print("KERNEL_OK")
</pallas_src>

<mosaic_0001>
module attributes {stable_mosaic.version = 11 : i64} {
  func.func @lstm_kernel(%arg0: i32, %arg1: memref<64x16xf32, #tpu.memory_space<vmem>>, %arg2: memref<16x512xf32, #tpu.memory_space<vmem>>, %arg3: memref<128x512xf32, #tpu.memory_space<vmem>>, %arg4: memref<1x512xf32, #tpu.memory_space<vmem>>, %arg5: memref<128x10xf32, #tpu.memory_space<vmem>>, %arg6: memref<1x10xf32, #tpu.memory_space<vmem>>, %arg7: memref<64x10xf32, #tpu.memory_space<vmem>>, %arg8: memref<64x512xf32, #tpu.memory_space<vmem>>, %arg9: memref<64x128xf32, #tpu.memory_space<vmem>>) attributes {dimension_semantics = [#tpu.dimension_semantics<arbitrary>], iteration_bounds = array<i64: 1>, scalar_prefetch = 0 : i64, scratch_operands = 2 : i64, tpu.core_type = #tpu.core_type<tc>, window_params = [{pipeline_mode = #tpu.pipeline_mode<synchronous>, transform_indices = @transform_0, window_bounds = array<i64: 64, 16>}, {pipeline_mode = #tpu.pipeline_mode<synchronous>, transform_indices = @transform_1, window_bounds = array<i64: 16, 512>}, {pipeline_mode = #tpu.pipeline_mode<synchronous>, transform_indices = @transform_2, window_bounds = array<i64: 128, 512>}, {pipeline_mode = #tpu.pipeline_mode<synchronous>, transform_indices = @transform_3, window_bounds = array<i64: 1, 512>}, {pipeline_mode = #tpu.pipeline_mode<synchronous>, transform_indices = @transform_4, window_bounds = array<i64: 128, 10>}, {pipeline_mode = #tpu.pipeline_mode<synchronous>, transform_indices = @transform_5, window_bounds = array<i64: 1, 10>}, {pipeline_mode = #tpu.pipeline_mode<synchronous>, transform_indices = @transform_6, window_bounds = array<i64: 64, 10>}]} {
    %c0 = arith.constant 0 : index
    %c0_0 = arith.constant 0 : index
    %0 = vector.load %arg1[%c0, %c0_0] : memref<64x16xf32, #tpu.memory_space<vmem>>, vector<64x16xf32>
    %c0_1 = arith.constant 0 : index
    %c0_2 = arith.constant 0 : index
    %1 = vector.load %arg2[%c0_1, %c0_2] : memref<16x512xf32, #tpu.memory_space<vmem>>, vector<16x512xf32>
    %cst = arith.constant dense<0.000000e+00> : vector<64x512xf32>
    %2 = tpu.matmul %0, %1, %cst {dimension_numbers = #tpu.dot_dimension_numbers<[1], [0], [0], [1], [0, 0, 1, 1], [], []>} : vector<64x16xf32>, vector<16x512xf32>, vector<64x512xf32> -> vector<64x512xf32>
    %c0_3 = arith.constant 0 : index
    %c0_4 = arith.constant 0 : index
    %3 = vector.load %arg4[%c0_3, %c0_4] : memref<1x512xf32, #tpu.memory_space<vmem>>, vector<1x512xf32>
    %4 = vector.broadcast %3 : vector<1x512xf32> to vector<64x512xf32>
    %5 = arith.addf %2, %4 : vector<64x512xf32>
    %c0_5 = arith.constant 0 : index
    %c0_6 = arith.constant 0 : index
    %6 = vector.load %arg8[%c0_5, %c0_6] : memref<64x512xf32, #tpu.memory_space<vmem>>, vector<64x512xf32>
    tpu.vector_store %arg8[%c0_5, %c0_6], %5 {strides = array<i32>} : memref<64x512xf32, #tpu.memory_space<vmem>>, vector<64x512xf32>,
    %c0_7 = arith.constant 0 : index
    %c0_8 = arith.constant 0 : index
    %7 = vector.load %arg3[%c0_7, %c0_8] : memref<128x512xf32, #tpu.memory_space<vmem>>, vector<128x512xf32>
    %cst_9 = arith.constant 0.000000e+00 : f32
    %8 = vector.broadcast %cst_9 : f32 to vector<8x128xf32>
    %cst_10 = arith.constant 0.000000e+00 : f32
    %9 = vector.broadcast %cst_10 : f32 to vector<8x128xf32>
    %cst_11 = arith.constant dense<0.000000e+00> : vector<8x512xf32>
    %10 = tpu.matmul %8, %7, %cst_11 {dimension_numbers = #tpu.dot_dimension_numbers<[1], [0], [0], [1], [0, 0, 1, 1], [], []>} : vector<8x128xf32>, vector<128x512xf32>, vector<8x512xf32> -> vector<8x512xf32>
    %c0_12 = arith.constant 0 : index
    %c0_13 = arith.constant 0 : index
    %11 = vector.load %arg8[%c0_12, %c0_13] : memref<64x512xf32, #tpu.memory_space<vmem>>, vector<8x512xf32>
    %12 = arith.addf %10, %11 : vector<8x512xf32>
    %13 = vector.extract_strided_slice %12 {offsets = [0, 0], sizes = [8, 128], strides = [1, 1]} : vector<8x512xf32> to vector<8x128xf32>
    %14 = arith.negf %13 : vector<8x128xf32>
    %15 = math.exp %14 : vector<8x128xf32>
    %cst_14 = arith.constant 1.000000e+00 : f32
    %16 = vector.broadcast %cst_14 : f32 to vector<8x128xf32>
    %17 = arith.addf %16, %15 : vector<8x128xf32>
    %18 = arith.divf %16, %17 : vector<8x128xf32>
    %19 = vector.extract_strided_slice %12 {offsets = [0, 128], sizes = [8, 128], strides = [1, 1]} : vector<8x512xf32> to vector<8x128xf32>
    %20 = arith.negf %19 : vector<8x128xf32>
    %21 = math.exp %20 : vector<8x128xf32>
    %cst_15 = arith.constant 1.000000e+00 : f32
    %22 = vector.broadcast %cst_15 : f32 to vector<8x128xf32>
    %23 = arith.addf %22, %21 : vector<8x128xf32>
    %24 = arith.divf %22, %23 : vector<8x128xf32>
    %25 = vector.extract_strided_slice %12 {offsets = [0, 256], sizes = [8, 128], strides = [1, 1]} : vector<8x512xf32> to vector<8x128xf32>
    %26 = math.tanh %25 : vector<8x128xf32>
    %27 = vector.extract_strided_slice %12 {offsets = [0, 384], sizes = [8, 128], strides = [1, 1]} : vector<8x512xf32> to vector<8x128xf32>
    %28 = arith.negf %27 : vector<8x128xf32>
    %29 = math.exp %28 : vector<8x128xf32>
    %cst_16 = arith.constant 1.000000e+00 : f32
    %30 = vector.broadcast %cst_16 : f32 to vector<8x128xf32>
    %31 = arith.addf %30, %29 : vector<8x128xf32>
    %32 = arith.divf %30, %31 : vector<8x128xf32>
    %33 = arith.mulf %24, %9 : vector<8x128xf32>
    %34 = arith.mulf %18, %26 : vector<8x128xf32>
    %35 = arith.addf %33, %34 : vector<8x128xf32>
    %36 = math.tanh %35 : vector<8x128xf32>
    %37 = arith.mulf %32, %36 : vector<8x128xf32>
    %c0_17 = arith.constant 0 : index
    %c0_18 = arith.constant 0 : index
    %38 = vector.load %arg9[%c0_17, %c0_18] : memref<64x128xf32, #tpu.memory_space<vmem>>, vector<8x128xf32>
    tpu.vector_store %arg9[%c0_17, %c0_18], %37 {strides = array<i32>} : memref<64x128xf32, #tpu.memory_space<vmem>>, vector<8x128xf32>,
    %cst_19 = arith.constant dense<0.000000e+00> : vector<8x512xf32>
    %39 = tpu.matmul %37, %7, %cst_19 {dimension_numbers = #tpu.dot_dimension_numbers<[1], [0], [0], [1], [0, 0, 1, 1], [], []>} : vector<8x128xf32>, vector<128x512xf32>, vector<8x512xf32> -> vector<8x512xf32>
    %c8 = arith.constant 8 : index
    %c0_20 = arith.constant 0 : index
    %40 = vector.load %arg8[%c8, %c0_20] : memref<64x512xf32, #tpu.memory_space<vmem>>, vector<8x512xf32>
    %41 = arith.addf %39, %40 : vector<8x512xf32>
    %42 = vector.extract_strided_slice %41 {offsets = [0, 0], sizes = [8, 128], strides = [1, 1]} : vector<8x512xf32> to vector<8x128xf32>
    %43 = arith.negf %42 : vector<8x128xf32>
    %44 = math.exp %43 : vector<8x128xf32>
    %cst_21 = arith.constant 1.000000e+00 : f32
    %45 = vector.broadcast %cst_21 : f32 to vector<8x128xf32>
    %46 = arith.addf %45, %44 : vector<8x128xf32>
    %47 = arith.divf %45, %46 : vector<8x128xf32>
    %48 = vector.extract_strided_slice %41 {offsets = [0, 128], sizes = [8, 128], strides = [1, 1]} : vector<8x512xf32> to vector<8x128xf32>
    %49 = arith.negf %48 : vector<8x128xf32>
    %50 = math.exp %49 : vector<8x128xf32>
    %cst_22 = arith.constant 1.000000e+00 : f32
    %51 = vector.broadcast %cst_22 : f32 to vector<8x128xf32>
    %52 = arith.addf %51, %50 : vector<8x128xf32>
    %53 = arith.divf %51, %52 : vector<8x128xf32>
    %54 = vector.extract_strided_slice %41 {offsets = [0, 256], sizes = [8, 128], strides = [1, 1]} : vector<8x512xf32> to vector<8x128xf32>
    %55 = math.tanh %54 : vector<8x128xf32>
    %56 = vector.extract_strided_slice %41 {offsets = [0, 384], sizes = [8, 128], strides = [1, 1]} : vector<8x512xf32> to vector<8x128xf32>
    %57 = arith.negf %56 : vector<8x128xf32>
    %58 = math.exp %57 : vector<8x128xf32>
    %cst_23 = arith.constant 1.000000e+00 : f32
    %59 = vector.broadcast %cst_23 : f32 to vector<8x128xf32>
    %60 = arith.addf %59, %58 : vector<8x128xf32>
    %61 = arith.divf %59, %60 : vector<8x128xf32>
    %62 = arith.mulf %53, %35 : vector<8x128xf32>
    %63 = arith.mulf %47, %55 : vector<8x128xf32>
    %64 = arith.addf %62, %63 : vector<8x128xf32>
    %65 = math.tanh %64 : vector<8x128xf32>
    %66 = arith.mulf %61, %65 : vector<8x128xf32>
    %c8_24 = arith.constant 8 : index
    %c0_25 = arith.constant 0 : index
    %67 = vector.load %arg9[%c8_24, %c0_25] : memref<64x128xf32, #tpu.memory_space<vmem>>, vector<8x128xf32>
    tpu.vector_store %arg9[%c8_24, %c0_25], %66 {strides = array<i32>} : memref<64x128xf32, #tpu.memory_space<vmem>>, vector<8x128xf32>,
    %cst_26 = arith.constant dense<0.000000e+00> : vector<8x512xf32>
    %68 = tpu.matmul %66, %7, %cst_26 {dimension_numbers = #tpu.dot_dimension_numbers<[1], [0], [0], [1], [0, 0, 1, 1], [], []>} : vector<8x128xf32>, vector<128x512xf32>, vector<8x512xf32> -> vector<8x512xf32>
    %c16 = arith.constant 16 : index
    %c0_27 = arith.constant 0 : index
    %69 = vector.load %arg8[%c16, %c0_27] : memref<64x512xf32, #tpu.memory_space<vmem>>, vector<8x512xf32>
    %70 = arith.addf %68, %69 : vector<8x512xf32>
    %71 = vector.extract_strided_slice %70 {offsets = [0, 0], sizes = [8, 128], strides = [1, 1]} : vector<8x512xf32> to vector<8x128xf32>
    %72 = arith.negf %71 : vector<8x128xf32>
    %73 = math.exp %72 : vector<8x128xf32>
    %cst_28 = arith.constant 1.000000e+00 : f32
    %74 = vector.broadcast %cst_28 : f32 to vector<8x128xf32>
    %75 = arith.addf %74, %73 : vector<8x128xf32>
    %76 = arith.divf %74, %75 : vector<8x128xf32>
    %77 = vector.extract_strided_slice %70 {offsets = [0, 128], sizes = [8, 128], strides = [1, 1]} : vector<8x512xf32> to vector<8x128xf32>
    %78 = arith.negf %77 : vector<8x128xf32>
    %79 = math.exp %78 : vector<8x128xf32>
    %cst_29 = arith.constant 1.000000e+00 : f32
    %80 = vector.broadcast %cst_29 : f32 to vector<8x128xf32>
    %81 = arith.addf %80, %79 : vector<8x128xf32>
    %82 = arith.divf %80, %81 : vector<8x128xf32>
    %83 = vector.extract_strided_slice %70 {offsets = [0, 256], sizes = [8, 128], strides = [1, 1]} : vector<8x512xf32> to vector<8x128xf32>
    %84 = math.tanh %83 : vector<8x128xf32>
    %85 = vector.extract_strided_slice %70 {offsets = [0, 384], sizes = [8, 128], strides = [1, 1]} : vector<8x512xf32> to vector<8x128xf32>
    %86 = arith.negf %85 : vector<8x128xf32>
    %87 = math.exp %86 : vector<8x128xf32>
    %cst_30 = arith.constant 1.000000e+00 : f32
    %88 = vector.broadcast %cst_30 : f32 to vector<8x128xf32>
    %89 = arith.addf %88, %87 : vector<8x128xf32>
    %90 = arith.divf %88, %89 : vector<8x128xf32>
    %91 = arith.mulf %82, %64 : vector<8x128xf32>
    %92 = arith.mulf %76, %84 : vector<8x128xf32>
    %93 = arith.addf %91, %92 : vector<8x128xf32>
    %94 = math.tanh %93 : vector<8x128xf32>
    %95 = arith.mulf %90, %94 : vector<8x128xf32>
    %c16_31 = arith.constant 16 : index
    %c0_32 = arith.constant 0 : index
    %96 = vector.load %arg9[%c16_31, %c0_32] : memref<64x128xf32, #tpu.memory_space<vmem>>, vector<8x128xf32>
    tpu.vector_store %arg9[%c16_31, %c0_32], %95 {strides = array<i32>} : memref<64x128xf32, #tpu.memory_space<vmem>>, vector<8x128xf32>,
    %cst_33 = arith.constant dense<0.000000e+00> : vector<8x512xf32>
    %97 = tpu.matmul %95, %7, %cst_33 {dimension_numbers = #tpu.dot_dimension_numbers<[1], [0], [0], [1], [0, 0, 1, 1], [], []>} : vector<8x128xf32>, vector<128x512xf32>, vector<8x512xf32> -> vector<8x512xf32>
    %c24 = arith.constant 24 : index
    %c0_34 = arith.constant 0 : index
    %98 = vector.load %arg8[%c24, %c0_34] : memref<64x512xf32, #tpu.memory_space<vmem>>, vector<8x512xf32>
    %99 = arith.addf %97, %98 : vector<8x512xf32>
    %100 = vector.extract_strided_slice %99 {offsets = [0, 0], sizes = [8, 128], strides = [1, 1]} : vector<8x512xf32> to vector<8x128xf32>
    %101 = arith.negf %100 : vector<8x128xf32>
    %102 = math.exp %101 : vector<8x128xf32>
    %cst_35 = arith.constant 1.000000e+00 : f32
    %103 = vector.broadcast %cst_35 : f32 to vector<8x128xf32>
    %104 = arith.addf %103, %102 : vector<8x128xf32>
    %105 = arith.divf %103, %104 : vector<8x128xf32>
    %106 = vector.extract_strided_slice %99 {offsets = [0, 128], sizes = [8, 128], strides = [1, 1]} : vector<8x512xf32> to vector<8x128xf32>
    %107 = arith.negf %106 : vector<8x128xf32>
    %108 = math.exp %107 : vector<8x128xf32>
    %cst_36 = arith.constant 1.000000e+00 : f32
    %109 = vector.broadcast %cst_36 : f32 to vector<8x128xf32>
    %110 = arith.addf %109, %108 : vector<8x128xf32>
    %111 = arith.divf %109, %110 : vector<8x128xf32>
    %112 = vector.extract_strided_slice %99 {offsets = [0, 256], sizes = [8, 128], strides = [1, 1]} : vector<8x512xf32> to vector<8x128xf32>
    %113 = math.tanh %112 : vector<8x128xf32>
    %114 = vector.extract_strided_slice %99 {offsets = [0, 384], sizes = [8, 128], strides = [1, 1]} : vector<8x512xf32> to vector<8x128xf32>
    %115 = arith.negf %114 : vector<8x128xf32>
    %116 = math.exp %115 : vector<8x128xf32>
    %cst_37 = arith.constant 1.000000e+00 : f32
    %117 = vector.broadcast %cst_37 : f32 to vector<8x128xf32>
    %118 = arith.addf %117, %116 : vector<8x128xf32>
    %119 = arith.divf %117, %118 : vector<8x128xf32>
    %120 = arith.mulf %111, %93 : vector<8x128xf32>
    %121 = arith.mulf %105, %113 : vector<8x128xf32>
    %122 = arith.addf %120, %121 : vector<8x128xf32>
    %123 = math.tanh %122 : vector<8x128xf32>
    %124 = arith.mulf %119, %123 : vector<8x128xf32>
    %c24_38 = arith.constant 24 : index
    %c0_39 = arith.constant 0 : index
    %125 = vector.load %arg9[%c24_38, %c0_39] : memref<64x128xf32, #tpu.memory_space<vmem>>, vector<8x128xf32>
    tpu.vector_store %arg9[%c24_38, %c0_39], %124 {strides = array<i32>} : memref<64x128xf32, #tpu.memory_space<vmem>>, vector<8x128xf32>,
    %cst_40 = arith.constant dense<0.000000e+00> : vector<8x512xf32>
    %126 = tpu.matmul %124, %7, %cst_40 {dimension_numbers = #tpu.dot_dimension_numbers<[1], [0], [0], [1], [0, 0, 1, 1], [], []>} : vector<8x128xf32>, vector<128x512xf32>, vector<8x512xf32> -> vector<8x512xf32>
    %c32 = arith.constant 32 : index
    %c0_41 = arith.constant 0 : index
    %127 = vector.load %arg8[%c32, %c0_41] : memref<64x512xf32, #tpu.memory_space<vmem>>, vector<8x512xf32>
    %128 = arith.addf %126, %127 : vector<8x512xf32>
    %129 = vector.extract_strided_slice %128 {offsets = [0, 0], sizes = [8, 128], strides = [1, 1]} : vector<8x512xf32> to vector<8x128xf32>
    %130 = arith.negf %129 : vector<8x128xf32>
    %131 = math.exp %130 : vector<8x128xf32>
    %cst_42 = arith.constant 1.000000e+00 : f32
    %132 = vector.broadcast %cst_42 : f32 to vector<8x128xf32>
    %133 = arith.addf %132, %131 : vector<8x128xf32>
    %134 = arith.divf %132, %133 : vector<8x128xf32>
    %135 = vector.extract_strided_slice %128 {offsets = [0, 128], sizes = [8, 128], strides = [1, 1]} : vector<8x512xf32> to vector<8x128xf32>
    %136 = arith.negf %135 : vector<8x128xf32>
    %137 = math.exp %136 : vector<8x128xf32>
    %cst_43 = arith.constant 1.000000e+00 : f32
    %138 = vector.broadcast %cst_43 : f32 to vector<8x128xf32>
    %139 = arith.addf %138, %137 : vector<8x128xf32>
    %140 = arith.divf %138, %139 : vector<8x128xf32>
    %141 = vector.extract_strided_slice %128 {offsets = [0, 256], sizes = [8, 128], strides = [1, 1]} : vector<8x512xf32> to vector<8x128xf32>
    %142 = math.tanh %141 : vector<8x128xf32>
    %143 = vector.extract_strided_slice %128 {offsets = [0, 384], sizes = [8, 128], strides = [1, 1]} : vector<8x512xf32> to vector<8x128xf32>
    %144 = arith.negf %143 : vector<8x128xf32>
    %145 = math.exp %144 : vector<8x128xf32>
    %cst_44 = arith.constant 1.000000e+00 : f32
    %146 = vector.broadcast %cst_44 : f32 to vector<8x128xf32>
    %147 = arith.addf %146, %145 : vector<8x128xf32>
    %148 = arith.divf %146, %147 : vector<8x128xf32>
    %149 = arith.mulf %140, %122 : vector<8x128xf32>
    %150 = arith.mulf %134, %142 : vector<8x128xf32>
    %151 = arith.addf %149, %150 : vector<8x128xf32>
    %152 = math.tanh %151 : vector<8x128xf32>
    %153 = arith.mulf %148, %152 : vector<8x128xf32>
    %c32_45 = arith.constant 32 : index
    %c0_46 = arith.constant 0 : index
    %154 = vector.load %arg9[%c32_45, %c0_46] : memref<64x128xf32, #tpu.memory_space<vmem>>, vector<8x128xf32>
    tpu.vector_store %arg9[%c32_45, %c0_46], %153 {strides = array<i32>} : memref<64x128xf32, #tpu.memory_space<vmem>>, vector<8x128xf32>,
    %cst_47 = arith.constant dense<0.000000e+00> : vector<8x512xf32>
    %155 = tpu.matmul %153, %7, %cst_47 {dimension_numbers = #tpu.dot_dimension_numbers<[1], [0], [0], [1], [0, 0, 1, 1], [], []>} : vector<8x128xf32>, vector<128x512xf32>, vector<8x512xf32> -> vector<8x512xf32>
    %c40 = arith.constant 40 : index
    %c0_48 = arith.constant 0 : index
    %156 = vector.load %arg8[%c40, %c0_48] : memref<64x512xf32, #tpu.memory_space<vmem>>, vector<8x512xf32>
    %157 = arith.addf %155, %156 : vector<8x512xf32>
    %158 = vector.extract_strided_slice %157 {offsets = [0, 0], sizes = [8, 128], strides = [1, 1]} : vector<8x512xf32> to vector<8x128xf32>
    %159 = arith.negf %158 : vector<8x128xf32>
    %160 = math.exp %159 : vector<8x128xf32>
    %cst_49 = arith.constant 1.000000e+00 : f32
    %161 = vector.broadcast %cst_49 : f32 to vector<8x128xf32>
    %162 = arith.addf %161, %160 : vector<8x128xf32>
    %163 = arith.divf %161, %162 : vector<8x128xf32>
    %164 = vector.extract_strided_slice %157 {offsets = [0, 128], sizes = [8, 128], strides = [1, 1]} : vector<8x512xf32> to vector<8x128xf32>
    %165 = arith.negf %164 : vector<8x128xf32>
    %166 = math.exp %165 : vector<8x128xf32>
    %cst_50 = arith.constant 1.000000e+00 : f32
    %167 = vector.broadcast %cst_50 : f32 to vector<8x128xf32>
    %168 = arith.addf %167, %166 : vector<8x128xf32>
    %169 = arith.divf %167, %168 : vector<8x128xf32>
    %170 = vector.extract_strided_slice %157 {offsets = [0, 256], sizes = [8, 128], strides = [1, 1]} : vector<8x512xf32> to vector<8x128xf32>
    %171 = math.tanh %170 : vector<8x128xf32>
    %172 = vector.extract_strided_slice %157 {offsets = [0, 384], sizes = [8, 128], strides = [1, 1]} : vector<8x512xf32> to vector<8x128xf32>
    %173 = arith.negf %172 : vector<8x128xf32>
    %174 = math.exp %173 : vector<8x128xf32>
    %cst_51 = arith.constant 1.000000e+00 : f32
    %175 = vector.broadcast %cst_51 : f32 to vector<8x128xf32>
    %176 = arith.addf %175, %174 : vector<8x128xf32>
    %177 = arith.divf %175, %176 : vector<8x128xf32>
    %178 = arith.mulf %169, %151 : vector<8x128xf32>
    %179 = arith.mulf %163, %171 : vector<8x128xf32>
    %180 = arith.addf %178, %179 : vector<8x128xf32>
    %181 = math.tanh %180 : vector<8x128xf32>
    %182 = arith.mulf %177, %181 : vector<8x128xf32>
    %c40_52 = arith.constant 40 : index
    %c0_53 = arith.constant 0 : index
    %183 = vector.load %arg9[%c40_52, %c0_53] : memref<64x128xf32, #tpu.memory_space<vmem>>, vector<8x128xf32>
    tpu.vector_store %arg9[%c40_52, %c0_53], %182 {strides = array<i32>} : memref<64x128xf32, #tpu.memory_space<vmem>>, vector<8x128xf32>,
    %cst_54 = arith.constant dense<0.000000e+00> : vector<8x512xf32>
    %184 = tpu.matmul %182, %7, %cst_54 {dimension_numbers = #tpu.dot_dimension_numbers<[1], [0], [0], [1], [0, 0, 1, 1], [], []>} : vector<8x128xf32>, vector<128x512xf32>, vector<8x512xf32> -> vector<8x512xf32>
    %c48 = arith.constant 48 : index
    %c0_55 = arith.constant 0 : index
    %185 = vector.load %arg8[%c48, %c0_55] : memref<64x512xf32, #tpu.memory_space<vmem>>, vector<8x512xf32>
    %186 = arith.addf %184, %185 : vector<8x512xf32>
    %187 = vector.extract_strided_slice %186 {offsets = [0, 0], sizes = [8, 128], strides = [1, 1]} : vector<8x512xf32> to vector<8x128xf32>
    %188 = arith.negf %187 : vector<8x128xf32>
    %189 = math.exp %188 : vector<8x128xf32>
    %cst_56 = arith.constant 1.000000e+00 : f32
    %190 = vector.broadcast %cst_56 : f32 to vector<8x128xf32>
    %191 = arith.addf %190, %189 : vector<8x128xf32>
    %192 = arith.divf %190, %191 : vector<8x128xf32>
    %193 = vector.extract_strided_slice %186 {offsets = [0, 128], sizes = [8, 128], strides = [1, 1]} : vector<8x512xf32> to vector<8x128xf32>
    %194 = arith.negf %193 : vector<8x128xf32>
    %195 = math.exp %194 : vector<8x128xf32>
    %cst_57 = arith.constant 1.000000e+00 : f32
    %196 = vector.broadcast %cst_57 : f32 to vector<8x128xf32>
    %197 = arith.addf %196, %195 : vector<8x128xf32>
    %198 = arith.divf %196, %197 : vector<8x128xf32>
    %199 = vector.extract_strided_slice %186 {offsets = [0, 256], sizes = [8, 128], strides = [1, 1]} : vector<8x512xf32> to vector<8x128xf32>
    %200 = math.tanh %199 : vector<8x128xf32>
    %201 = vector.extract_strided_slice %186 {offsets = [0, 384], sizes = [8, 128], strides = [1, 1]} : vector<8x512xf32> to vector<8x128xf32>
    %202 = arith.negf %201 : vector<8x128xf32>
    %203 = math.exp %202 : vector<8x128xf32>
    %cst_58 = arith.constant 1.000000e+00 : f32
    %204 = vector.broadcast %cst_58 : f32 to vector<8x128xf32>
    %205 = arith.addf %204, %203 : vector<8x128xf32>
    %206 = arith.divf %204, %205 : vector<8x128xf32>
    %207 = arith.mulf %198, %180 : vector<8x128xf32>
    %208 = arith.mulf %192, %200 : vector<8x128xf32>
    %209 = arith.addf %207, %208 : vector<8x128xf32>
    %210 = math.tanh %209 : vector<8x128xf32>
    %211 = arith.mulf %206, %210 : vector<8x128xf32>
    %c48_59 = arith.constant 48 : index
    %c0_60 = arith.constant 0 : index
    %212 = vector.load %arg9[%c48_59, %c0_60] : memref<64x128xf32, #tpu.memory_space<vmem>>, vector<8x128xf32>
    tpu.vector_store %arg9[%c48_59, %c0_60], %211 {strides = array<i32>} : memref<64x128xf32, #tpu.memory_space<vmem>>, vector<8x128xf32>,
    %cst_61 = arith.constant dense<0.000000e+00> : vector<8x512xf32>
    %213 = tpu.matmul %211, %7, %cst_61 {dimension_numbers = #tpu.dot_dimension_numbers<[1], [0], [0], [1], [0, 0, 1, 1], [], []>} : vector<8x128xf32>, vector<128x512xf32>, vector<8x512xf32> -> vector<8x512xf32>
    %c56 = arith.constant 56 : index
    %c0_62 = arith.constant 0 : index
    %214 = vector.load %arg8[%c56, %c0_62] : memref<64x512xf32, #tpu.memory_space<vmem>>, vector<8x512xf32>
    %215 = arith.addf %213, %214 : vector<8x512xf32>
    %216 = vector.extract_strided_slice %215 {offsets = [0, 0], sizes = [8, 128], strides = [1, 1]} : vector<8x512xf32> to vector<8x128xf32>
    %217 = arith.negf %216 : vector<8x128xf32>
    %218 = math.exp %217 : vector<8x128xf32>
    %cst_63 = arith.constant 1.000000e+00 : f32
    %219 = vector.broadcast %cst_63 : f32 to vector<8x128xf32>
    %220 = arith.addf %219, %218 : vector<8x128xf32>
    %221 = arith.divf %219, %220 : vector<8x128xf32>
    %222 = vector.extract_strided_slice %215 {offsets = [0, 128], sizes = [8, 128], strides = [1, 1]} : vector<8x512xf32> to vector<8x128xf32>
    %223 = arith.negf %222 : vector<8x128xf32>
    %224 = math.exp %223 : vector<8x128xf32>
    %cst_64 = arith.constant 1.000000e+00 : f32
    %225 = vector.broadcast %cst_64 : f32 to vector<8x128xf32>
    %226 = arith.addf %225, %224 : vector<8x128xf32>
    %227 = arith.divf %225, %226 : vector<8x128xf32>
    %228 = vector.extract_strided_slice %215 {offsets = [0, 256], sizes = [8, 128], strides = [1, 1]} : vector<8x512xf32> to vector<8x128xf32>
    %229 = math.tanh %228 : vector<8x128xf32>
    %230 = vector.extract_strided_slice %215 {offsets = [0, 384], sizes = [8, 128], strides = [1, 1]} : vector<8x512xf32> to vector<8x128xf32>
    %231 = arith.negf %230 : vector<8x128xf32>
    %232 = math.exp %231 : vector<8x128xf32>
    %cst_65 = arith.constant 1.000000e+00 : f32
    %233 = vector.broadcast %cst_65 : f32 to vector<8x128xf32>
    %234 = arith.addf %233, %232 : vector<8x128xf32>
    %235 = arith.divf %233, %234 : vector<8x128xf32>
    %236 = arith.mulf %227, %209 : vector<8x128xf32>
    %237 = arith.mulf %221, %229 : vector<8x128xf32>
    %238 = arith.addf %236, %237 : vector<8x128xf32>
    %239 = math.tanh %238 : vector<8x128xf32>
    %240 = arith.mulf %235, %239 : vector<8x128xf32>
    %c56_66 = arith.constant 56 : index
    %c0_67 = arith.constant 0 : index
    %241 = vector.load %arg9[%c56_66, %c0_67] : memref<64x128xf32, #tpu.memory_space<vmem>>, vector<8x128xf32>
    tpu.vector_store %arg9[%c56_66, %c0_67], %240 {strides = array<i32>} : memref<64x128xf32, #tpu.memory_space<vmem>>, vector<8x128xf32>,
    %c0_68 = arith.constant 0 : index
    %c0_69 = arith.constant 0 : index
    %242 = vector.load %arg9[%c0_68, %c0_69] : memref<64x128xf32, #tpu.memory_space<vmem>>, vector<64x128xf32>
    %c0_70 = arith.constant 0 : index
    %c0_71 = arith.constant 0 : index
    %243 = vector.load %arg5[%c0_70, %c0_71] : memref<128x10xf32, #tpu.memory_space<vmem>>, vector<128x10xf32>
    %cst_72 = arith.constant dense<0.000000e+00> : vector<64x10xf32>
    %244 = tpu.matmul %242, %243, %cst_72 {dimension_numbers = #tpu.dot_dimension_numbers<[1], [0], [0], [1], [0, 0, 1, 1], [], []>} : vector<64x128xf32>, vector<128x10xf32>, vector<64x10xf32> -> vector<64x10xf32>
    %c0_73 = arith.constant 0 : index
    %c0_74 = arith.constant 0 : index
    %245 = vector.load %arg6[%c0_73, %c0_74] : memref<1x10xf32, #tpu.memory_space<vmem>>, vector<1x10xf32>
    %246 = vector.broadcast %245 : vector<1x10xf32> to vector<64x10xf32>
    %247 = arith.addf %244, %246 : vector<64x10xf32>
    %c0_75 = arith.constant 0 : index
    %c0_76 = arith.constant 0 : index
    %248 = vector.load %arg7[%c0_75, %c0_76] : memref<64x10xf32, #tpu.memory_space<vmem>>, vector<64x10xf32>
    tpu.vector_store %arg7[%c0_75, %c0_76], %247 {strides = array<i32>} : memref<64x10xf32, #tpu.memory_space<vmem>>, vector<64x10xf32>,
    return
  }
  func.func @transform_0(%arg0: i32) -> (i32, i32) {
    %c0_i32 = arith.constant 0 : i32
    %c0_i32_0 = arith.constant 0 : i32
    %c0_i32_1 = arith.constant 0 : i32
    return %c0_i32, %c0_i32_0 : i32, i32
  }
  func.func @transform_1(%arg0: i32) -> (i32, i32) {
    %c0_i32 = arith.constant 0 : i32
    %c0_i32_0 = arith.constant 0 : i32
    %c0_i32_1 = arith.constant 0 : i32
    return %c0_i32, %c0_i32_0 : i32, i32
  }
  func.func @transform_2(%arg0: i32) -> (i32, i32) {
    %c0_i32 = arith.constant 0 : i32
    %c0_i32_0 = arith.constant 0 : i32
    %c0_i32_1 = arith.constant 0 : i32
    return %c0_i32, %c0_i32_0 : i32, i32
  }
  func.func @transform_3(%arg0: i32) -> (i32, i32) {
    %c0_i32 = arith.constant 0 : i32
    %c0_i32_0 = arith.constant 0 : i32
    %c0_i32_1 = arith.constant 0 : i32
    return %c0_i32, %c0_i32_0 : i32, i32
  }
  func.func @transform_4(%arg0: i32) -> (i32, i32) {
    %c0_i32 = arith.constant 0 : i32
    %c0_i32_0 = arith.constant 0 : i32
    %c0_i32_1 = arith.constant 0 : i32
    return %c0_i32, %c0_i32_0 : i32, i32
  }
  func.func @transform_5(%arg0: i32) -> (i32, i32) {
    %c0_i32 = arith.constant 0 : i32
    %c0_i32_0 = arith.constant 0 : i32
    %c0_i32_1 = arith.constant 0 : i32
    return %c0_i32, %c0_i32_0 : i32, i32
  }
  func.func @transform_6(%arg0: i32) -> (i32, i32) {
    %c0_i32 = arith.constant 0 : i32
    %c0_i32_0 = arith.constant 0 : i32
    %c0_i32_1 = arith.constant 0 : i32
    return %c0_i32, %c0_i32_0 : i32, i32
  }
}

</mosaic_0001>

<bundles_post_ra>
// kernel: tpu_custom_call.1
= control target key start
LH: loop header
LB: loop body
LE: loop exit
PB: predicated region body
PF: predicated region fallthrough
CT: control target
= control target key end

     0   :  { %11 = vsyncpa [#allocation5], 0  ;;  %s2267_s21 = smov [#allocation4]   ;;  %s3481_s0 = inlined_call_operand.vmem [shape: f32[64,16], index: 0, kind: input, shape index: {}]   ;;  %s3482_s1 = inlined_call_operand.vmem [shape: f32[16,512], index: 1, kind: input, shape index: {}]   ;;  %s3483_s2 = inlined_call_operand.hbm [shape: f32[128,512], index: 2, kind: input, shape index: {}]   ;;  %s3484_s3 = inlined_call_operand.vmem [shape: f32[1,512], index: 3, kind: input, shape index: {}]   ;;  %s3485_s4 = inlined_call_operand.vmem [shape: f32[128,10], index: 4, kind: input, shape index: {}]   ;;  %s3486_s5 = inlined_call_operand.vmem [shape: f32[1,10], index: 5, kind: input, shape index: {}]   ;;  %s3487_s6 = inlined_call_operand.vmem [shape: f32[64,10], index: 6, kind: output, shape index: {}]  }
   0x1   :  { %s21_s22 = sshll.u32 %s2267_s21, 4  ;;  %s22_s22 = int_to_ptr.vmem [resolvable:$true] %s21_s22 }
   0x2   :  { %s2253_s23 = scalar_lea.vmem %s22_s22, 8192  ;;  %p2258_p1 = scmp.lt.s32.totalorder %s22_s22, %s22_s22 }
   0x3   :  { %p2254_p0 = scmp.ne.s32.totalorder %s22_s22, %s2253_s23  ;;  %p2259_p2 = scmp.lt.s32.totalorder %s2253_s23, %s2253_s23 }
   0x5   :  { %p2260_p3 = por %p2259_p2, %p2258_p1 }
   0x7   :  { %p2261_p4 = pnand %p2260_p3, %p2254_p0 }
   0x9   :  { %2264 = shalt.err (!%p2261_p4)
}
   0xa   :  { %s2268_s24 = smov 512   ;;  %s2269_s25 = smov 32  }
   0xb   :  { %27 = dma.hbm_to_vmem [thread:$0]  %s3483_s2, 8192, %s22_s22, [#allocation5], %s2268_s24, %s2268_s24, %s2269_s25  }
   0xc   :  { %2265 = dma.done.wait [#allocation5], 8192  }
   0xd   :  { %2266 = vsyncadd [#allocation5], 4294959104  ;;  %v3488_v0 = vmov 0.0   ;;  %v52_v1 = vld [vmem:[%s3482_s1 + $0x38] sm:$0xff]  ;;  %v51_v2 = vld [vmem:[%s3482_s1 + $0x30] sm:$0xff]  ;;  %vm75_vm0 = vcmask 130048  }
   0xe   :  { %277 = vmatprep.mubr.f32.mxu1 %v3488_v0  ;;  %164 = vmatprep.mubr.f32.mxu0 %v3488_v0  ;;  %v48_v3 = vld [vmem:[%s3482_s1 + $0x18] sm:$0xff]  ;;  %v47_v4 = vld [vmem:[%s3482_s1 + $0x10] sm:$0xff]  ;;  %v2326_v5 = vld [vmem:[%s3481_s0] sm:$0xff]  ;;  %vm1926_vm1 = vcmask 80896  }
   0xf   :  { %241 = vmatprep.subr.mxu1 %v52_v1  ;;  %v2328_v6 = vld [vmem:[#allocation4 + $0x1e8] sm:$0xff]  ;;  %v2330_v7 = vld [vmem:[#allocation4 + $0x1e0] sm:$0xff]  ;;  %v2364_v15 = vld [vmem:[%s3481_s0 + $0x10] sm:$0xff] }
  0x10   :  { %242 = vmatpush1.msra.mxu1 %v51_v2  ;;  %3582 = vst [vmem:[#allocation7_spill] sm:$0xff] %v2328_v6  ;;  %v2332_v8 = vld [vmem:[#allocation4 + $0x1c8] sm:$0xff]  ;;  %v2337_v9 = vld [vmem:[#allocation4 + $0x1c0] sm:$0xff]  ;;  %v2390_v22 = vld [vmem:[%s3481_s0 + $0x18] sm:$0xff] }
  0x11   :  { %243 = vmatprep.subr.mxu1 %v48_v3  ;;  %v2344_v10 = vld [vmem:[%s3481_s0 + $0x8] sm:$0xff]  ;;  %v2349_v12 = vld [vmem:[#allocation4 + $0x1a0] sm:$0xff]  ;;  %v2459_v39 = vld [vmem:[%s3481_s0 + $0x30] sm:$0xff] }
  0x12   :  { %244 = vmatpush1.msra.mxu1 %v47_v4  ;;  %v2346_v11 = vld [vmem:[#allocation4 + $0x1a8] sm:$0xff]  ;;  %v2357_v14 = vld [vmem:[#allocation4 + $0x180] sm:$0xff]  ;;  %v2481_v44 = vld [vmem:[%s3481_s0 + $0x38] sm:$0xff] }
  0x13   :  { %1948 = vmatmul.mubr.msk.f32.vlgmr.msra.gmra.mxu1 %vm75_vm0, %v2326_v5  ;;  %426 = vmatprep.subr.mxu1 %v2328_v6  ;;  %v2352_v13 = vld [vmem:[#allocation4 + $0x188] sm:$0xff]  ;;  %v2369_v17 = vld [vmem:[#allocation4 + $0x160] sm:$0xff]  ;;  %v2501_v49 = vld [vmem:[#allocation4 + $0x1f8] sm:$0xff] }
  0x14   :  { %427 = vmatpush1.msra.mxu1 %v2330_v7  ;;  %283 = vmatprep.mubr.f32.mxu1 %v3488_v0  ;;  %v2366_v16 = vld [vmem:[#allocation4 + $0x168] sm:$0xff]  ;;  %v2380_v20 = vld [vmem:[#allocation4 + $0x140] sm:$0xff]  ;;  %3595 = vst [vmem:[#allocation20_spill] sm:$0xff] %v2501_v49  ;;  %v2504_v50 = vld [vmem:[#allocation4 + $0x1f0] sm:$0xff] }
  0x15   :  { %428 = vmatprep.subr.mxu1 %v2332_v8  ;;  %v2372_v18 = vld [vmem:[#allocation4 + $0x148] sm:$0xff]  ;;  %v49_v21 = vld [vmem:[%s3482_s1 + $0x20] sm:$0xff]  ;;  %v2508_v51 = vld [vmem:[#allocation4 + $0x1d8] sm:$0xff] }
  0x16   :  { %429 = vmatpush1.msra.mxu1 %v2337_v9  ;;  %v50_v19 = vld [vmem:[%s3482_s1 + $0x28] sm:$0xff]  ;;  %v2395_v24 = vld [vmem:[#allocation4 + $0x120] sm:$0xff]  ;;  %v2513_v52 = vld [vmem:[#allocation4 + $0x1d0] sm:$0xff] }
  0x17   :  { %1949 = vmatmul.mubr.msk.f32.gmra.mxu1 %vm75_vm0, %v2344_v10  ;;  %430 = vmatprep.subr.mxu1 %v2346_v11  ;;  %v2392_v23 = vld [vmem:[#allocation4 + $0x128] sm:$0xff]  ;;  %v2406_v27 = vld [vmem:[#allocation4 + $0x100] sm:$0xff]  ;;  %v2516_v53 = vld [vmem:[#allocation4 + $0x1b8] sm:$0xff] }
  0x18   :  { %431 = vmatpush1.msra.mxu1 %v2349_v12  ;;  %289 = vmatprep.mubr.f32.mxu1 %v3488_v0  ;;  %v2398_v25 = vld [vmem:[#allocation4 + $0x108] sm:$0xff]  ;;  %v45_v28 = vld [vmem:[%s3482_s1] sm:$0xff]  ;;  %v2520_v54 = vld [vmem:[#allocation4 + $0x1b0] sm:$0xff] }
  0x19   :  { %432 = vmatprep.subr.mxu1 %v2352_v13  ;;  %128 = vmatprep.subr.mxu0 %v50_v19  ;;  %v46_v26 = vld [vmem:[%s3482_s1 + $0x8] sm:$0xff]  ;;  %v2416_v29 = vld [vmem:[%s3481_s0 + $0x20] sm:$0xff]  ;;  %v2524_v55 = vld [vmem:[#allocation4 + $0x198] sm:$0xff] }
  0x1a   :  { %433 = vmatpush1.msra.mxu1 %v2357_v14  ;;  %129 = vmatpush1.msra.mxu0 %v49_v21  ;;  %v2418_v30 = vld [vmem:[#allocation4 + $0xe8] sm:$0xff]  ;;  %v2421_v31 = vld [vmem:[#allocation4 + $0xe0] sm:$0xff]  ;;  %v2528_v56 = vld [vmem:[#allocation4 + $0x190] sm:$0xff] }
  0x1b   :  { %1950 = vmatmul.mubr.msk.f32.gmra.mxu1 %vm75_vm0, %v2364_v15  ;;  %434 = vmatprep.subr.mxu1 %v2366_v16  ;;  %3583 = vst [vmem:[#allocation8_spill] sm:$0xff] %v2421_v31  ;;  %v2424_v32 = vld [vmem:[#allocation4 + $0xc8] sm:$0xff]  ;;  %v2429_v33 = vld [vmem:[#allocation4 + $0xc0] sm:$0xff]  ;;  %v2532_v57 = vld [vmem:[#allocation4 + $0x178] sm:$0xff] }
  0x1c   :  { %435 = vmatpush1.msra.mxu1 %v2369_v17  ;;  %295 = vmatprep.mubr.f32.mxu1 %v3488_v0  ;;  %3584 = vst [vmem:[#allocation9_spill] sm:$0xff] %v2424_v32  ;;  %3585 = vst [vmem:[#allocation10_spill] sm:$0xff] %v2429_v33  ;;  %v2436_v34 = vld [vmem:[%s3481_s0 + $0x28] sm:$0xff]  ;;  %v2441_v36 = vld [vmem:[#allocation4 + $0xa0] sm:$0xff] }
  0x1d   :  { %436 = vmatprep.subr.mxu1 %v2372_v18  ;;  %130 = vmatprep.subr.mxu0 %v46_v26  ;;  %v2438_v35 = vld [vmem:[#allocation4 + $0xa8] sm:$0xff]  ;;  %v2452_v38 = vld [vmem:[#allocation4 + $0x80] sm:$0xff]  ;;  %v2537_v58 = vld [vmem:[#allocation4 + $0x170] sm:$0xff] }
  0x1e   :  { %437 = vmatpush1.msra.mxu1 %v2380_v20  ;;  %131 = vmatpush1.msra.mxu0 %v45_v28  ;;  %v2446_v37 = vld [vmem:[#allocation4 + $0x88] sm:$0xff]  ;;  %3586 = vst [vmem:[#allocation11_spill] sm:$0xff] %v2452_v38  ;;  %v2464_v41 = vld [vmem:[#allocation4 + $0x60] sm:$0xff]  ;;  %v2541_v59 = vld [vmem:[#allocation4 + $0x158] sm:$0xff] }
  0x1f   :  { %1951 = vmatmul.mubr.msk.f32.gmra.mxu1 %vm75_vm0, %v2390_v22  ;;  %438 = vmatprep.subr.mxu1 %v2392_v23  ;;  %v2461_v40 = vld [vmem:[#allocation4 + $0x68] sm:$0xff]  ;;  %3588 = vst [vmem:[#allocation13_spill] sm:$0xff] %v2464_v41  ;;  %v2474_v43 = vld [vmem:[#allocation4 + $0x40] sm:$0xff]  ;;  %v2545_v60 = vld [vmem:[#allocation4 + $0x150] sm:$0xff] }
  0x20   :  { %439 = vmatpush1.msra.mxu1 %v2395_v24  ;;  %301 = vmatprep.mubr.f32.mxu1 %v3488_v0  ;;  %3587 = vst [vmem:[#allocation12_spill] sm:$0xff] %v2461_v40  ;;  %v2468_v42 = vld [vmem:[#allocation4 + $0x48] sm:$0xff]  ;;  %3590 = vst [vmem:[#allocation15_spill] sm:$0xff] %v2474_v43  ;;  %v2486_v46 = vld [vmem:[#allocation4 + $0x20] sm:$0xff] }
  0x21   :  { %440 = vmatprep.subr.mxu1 %v2398_v25  ;;  %1940 = vmatmul.mubr.msk.f32.vlgmr.msra.gmra.mxu0 %vm75_vm0, %v2326_v5  ;;  %3589 = vst [vmem:[#allocation14_spill] sm:$0xff] %v2468_v42  ;;  %v2483_v45 = vld [vmem:[#allocation4 + $0x28] sm:$0xff]  ;;  %3592 = vst [vmem:[#allocation17_spill] sm:$0xff] %v2486_v46  ;;  %v2497_v48 = vld [vmem:[#allocation4] sm:$0xff] }
  0x22   :  { %441 = vmatpush1.msra.mxu1 %v2406_v27  ;;  %597 = vmatprep.subr.mxu0 %v2328_v6  ;;  %3591 = vst [vmem:[#allocation16_spill] sm:$0xff] %v2483_v45  ;;  %v2490_v47 = vld [vmem:[#allocation4 + $0x8] sm:$0xff]  ;;  %3594 = vst [vmem:[#allocation19_spill] sm:$0xff] %v2497_v48  ;;  %v2549_v61 = vld [vmem:[#allocation4 + $0x138] sm:$0xff] }
  0x23   :  { %1952 = vmatmul.mubr.msk.f32.gmra.mxu1 %vm75_vm0, %v2416_v29  ;;  %442 = vmatprep.subr.mxu1 %v2418_v30  ;;  %3593 = vst [vmem:[#allocation18_spill] sm:$0xff] %v2490_v47  ;;  %v2553_v62 = vld [vmem:[#allocation4 + $0x130] sm:$0xff]  ;;  %v2557_v63 = vld [vmem:[#allocation4 + $0x118] sm:$0xff] }
  0x24   :  { %443 = vmatpush1.msra.mxu1 %v2421_v31  ;;  %307 = vmatprep.mubr.f32.mxu1 %v3488_v0  ;;  %v2562_v1 = vld [vmem:[#allocation4 + $0x110] sm:$0xff]  ;;  %v2566_v2 = vld [vmem:[#allocation4 + $0xf8] sm:$0xff] }
  0x25   :  { %444 = vmatprep.subr.mxu1 %v2424_v32  ;;  %598 = vmatpush1.msra.mxu0 %v2330_v7  ;;  %v2570_v3 = vld [vmem:[#allocation4 + $0xf0] sm:$0xff]  ;;  %v2574_v4 = vld [vmem:[#allocation4 + $0xd8] sm:$0xff] }
  0x26   :  { %445 = vmatpush1.msra.mxu1 %v2429_v33  ;;  %170 = vmatprep.mubr.f32.mxu0 %v3488_v0  ;;  %v2578_v5 = vld [vmem:[#allocation4 + $0xd0] sm:$0xff]  ;;  %v2591_v19 = vld [vmem:[#allocation4 + $0x98] sm:$0xff] }
  0x27   :  { %1953 = vmatmul.mubr.msk.f32.gmra.mxu1 %vm75_vm0, %v2436_v34  ;;  %446 = vmatprep.subr.mxu1 %v2438_v35  ;;  %3596 = vst [vmem:[#allocation21_spill] sm:$0xff] %v2591_v19  ;;  %v2595_v21 = vld [vmem:[#allocation4 + $0x90] sm:$0xff]  ;;  %v2607_v28 = vld [vmem:[#allocation4 + $0x58] sm:$0xff] }
  0x28   :  { %447 = vmatpush1.msra.mxu1 %v2441_v36  ;;  %313 = vmatprep.mubr.f32.mxu1 %v3488_v0  ;;  %3597 = vst [vmem:[#allocation22_spill] sm:$0xff] %v2595_v21  ;;  %v2603_v26 = vld [vmem:[#allocation4 + $0x70] sm:$0xff]  ;;  %3600 = vst [vmem:[#allocation25_spill] sm:$0xff] %v2607_v28 }
  0x29   :  { %448 = vmatprep.subr.mxu1 %v2446_v37  ;;  %599 = vmatprep.subr.mxu0 %v2332_v8  ;;  %3599 = vst [vmem:[#allocation24_spill] sm:$0xff] %v2603_v26 }
  0x2a   :  { %449 = vmatpush1.msra.mxu1 %v2452_v38  ;;  %1941 = vmatmul.mubr.msk.f32.gmra.mxu0 %vm75_vm0, %v2344_v10  ;;  %v2582_v10 = vld [vmem:[#allocation4 + $0xb8] sm:$0xff] }
  0x2b   :  { %1954 = vmatmul.mubr.msk.f32.gmra.mxu1 %vm75_vm0, %v2459_v39  ;;  %450 = vmatprep.subr.mxu1 %v2461_v40 }
  0x2c   :  { %451 = vmatpush1.msra.mxu1 %v2464_v41  ;;  %319 = vmatprep.mubr.f32.mxu1 %v3488_v0 }
  0x2d   :  { %452 = vmatprep.subr.mxu1 %v2468_v42  ;;  %600 = vmatpush1.msra.mxu0 %v2337_v9 }
  0x2e   :  { %453 = vmatpush1.msra.mxu1 %v2474_v43  ;;  %601 = vmatprep.subr.mxu0 %v2346_v11 }
  0x2f   :  { %1955 = vmatmul.mubr.msk.f32.gmra.mxu1 %vm75_vm0, %v2481_v44  ;;  %454 = vmatprep.subr.mxu1 %v2483_v45 }
  0x30   :  { %455 = vmatpush1.msra.mxu1 %v2486_v46  ;;  %490 = vmatprep.mubr.f32.mxu1 %v3488_v0 }
  0x31   :  { %456 = vmatprep.subr.mxu1 %v2490_v47  ;;  %602 = vmatpush1.msra.mxu0 %v2349_v12 }
  0x32   :  { %457 = vmatpush1.msra.mxu1 %v2497_v48  ;;  %176 = vmatprep.mubr.f32.mxu0 %v3488_v0 }
  0x33   :  { %491 = vmatmul.mubr.f32.vlgmr.msra.gmra.mxu1 %v3488_v0  ;;  %497 = vmatprep.subr.mxu1 %v2501_v49 }
  0x34   :  { %498 = vmatpush1.msra.mxu1 %v2504_v50  ;;  %561 = vmatprep.mubr.f32.mxu1 %v3488_v0 }
  0x35   :  { %499 = vmatprep.subr.mxu1 %v2508_v51  ;;  %603 = vmatprep.subr.mxu0 %v2352_v13 }
  0x36   :  { %500 = vmatpush1.msra.mxu1 %v2513_v52  ;;  %1942 = vmatmul.mubr.msk.f32.gmra.mxu0 %vm75_vm0, %v2364_v15  ;;  %v2587_v15 = vld [vmem:[#allocation4 + $0xb0] sm:$0xff] }
  0x37   :  { %501 = vmatprep.subr.mxu1 %v2516_v53  ;;  %604 = vmatpush1.msra.mxu0 %v2357_v14 }
  0x38   :  { %502 = vmatpush1.msra.mxu1 %v2520_v54  ;;  %605 = vmatprep.subr.mxu0 %v2366_v16 }
  0x39   :  { %503 = vmatprep.subr.mxu1 %v2524_v55  ;;  %606 = vmatpush1.msra.mxu0 %v2369_v17 }
  0x3a   :  { %504 = vmatpush1.msra.mxu1 %v2528_v56  ;;  %182 = vmatprep.mubr.f32.mxu0 %v3488_v0 }
  0x3b   :  { %505 = vmatprep.subr.mxu1 %v2532_v57  ;;  %607 = vmatprep.subr.mxu0 %v2372_v18 }
  0x3c   :  { %506 = vmatpush1.msra.mxu1 %v2537_v58  ;;  %1943 = vmatmul.mubr.msk.f32.gmra.mxu0 %vm75_vm0, %v2390_v22  ;;  %v2599_v22 = vld [vmem:[#allocation4 + $0x78] sm:$0xff] }
  0x3d   :  { %507 = vmatprep.subr.mxu1 %v2541_v59  ;;  %608 = vmatpush1.msra.mxu0 %v2380_v20  ;;  %3598 = vst [vmem:[#allocation23_spill] sm:$0xff] %v2599_v22 }
  0x3e   :  { %508 = vmatpush1.msra.mxu1 %v2545_v60  ;;  %609 = vmatprep.subr.mxu0 %v2392_v23 }
  0x3f   :  { %509 = vmatprep.subr.mxu1 %v2549_v61  ;;  %610 = vmatpush1.msra.mxu0 %v2395_v24 }
  0x40   :  { %510 = vmatpush1.msra.mxu1 %v2553_v62  ;;  %188 = vmatprep.mubr.f32.mxu0 %v3488_v0 }
  0x41   :  { %511 = vmatprep.subr.mxu1 %v2557_v63  ;;  %611 = vmatprep.subr.mxu0 %v2398_v25 }
  0x42   :  { %512 = vmatpush1.msra.mxu1 %v2562_v1  ;;  %1944 = vmatmul.mubr.msk.f32.gmra.mxu0 %vm75_vm0, %v2416_v29  ;;  %v2612_v29 = vld [vmem:[#allocation4 + $0x50] sm:$0xff] }
  0x43   :  { %513 = vmatprep.subr.mxu1 %v2566_v2  ;;  %612 = vmatpush1.msra.mxu0 %v2406_v27  ;;  %3601 = vst [vmem:[#allocation26_spill] sm:$0xff] %v2612_v29 }
  0x44   :  { %514 = vmatpush1.msra.mxu1 %v2570_v3  ;;  %613 = vmatprep.subr.mxu0 %v2418_v30 }
  0x45   :  { %515 = vmatprep.subr.mxu1 %v2574_v4  ;;  %614 = vmatpush1.msra.mxu0 %v2421_v31  ;;  %v3605_v31 = vmov 0.0  }
  0x46   :  { %516 = vmatpush1.msra.mxu1 %v2578_v5  ;;  %194 = vmatprep.mubr.f32.mxu0 %v3488_v0  ;;  %v2616_v0 = vld [vmem:[#allocation4 + $0x38] sm:$0xff] }
  0x47   :  { %517 = vmatprep.subr.mxu1 %v2582_v10  ;;  %615 = vmatprep.subr.mxu0 %v2424_v32  ;;  %3602 = vst [vmem:[#allocation27_spill] sm:$0xff] %v2616_v0  ;;  %v2620_v32 = vld [vmem:[#allocation4 + $0x30] sm:$0xff] }
  0x48   :  { %518 = vmatpush1.msra.mxu1 %v2587_v15  ;;  %1945 = vmatmul.mubr.msk.f32.gmra.mxu0 %vm75_vm0, %v2436_v34  ;;  %3603 = vst [vmem:[#allocation28_spill] sm:$0xff] %v2620_v32  ;;  %v2624_v34 = vld [vmem:[#allocation4 + $0x18] sm:$0xff] }
  0x49   :  { %519 = vmatprep.subr.mxu1 %v2591_v19  ;;  %616 = vmatpush1.msra.mxu0 %v2429_v33  ;;  %3604 = vst [vmem:[#allocation29_spill] sm:$0xff] %v2624_v34  ;;  %v2628_v33 = vld [vmem:[#allocation4 + $0x10] sm:$0xff] }
  0x4a   :  { %520 = vmatpush1.msra.mxu1 %v2595_v21  ;;  %617 = vmatprep.subr.mxu0 %v2438_v35  ;;  %3606 = vst [vmem:[#allocation30_spill] sm:$0xff] %v2628_v33 }
  0x4b   :  { %521 = vmatprep.subr.mxu1 %v2599_v22  ;;  %618 = vmatpush1.msra.mxu0 %v2441_v36 }
  0x4c   :  { %522 = vmatpush1.msra.mxu1 %v2603_v26  ;;  %200 = vmatprep.mubr.f32.mxu0 %v3605_v31 }
  0x4d   :  { %523 = vmatprep.subr.mxu1 %v2607_v28  ;;  %619 = vmatprep.subr.mxu0 %v2446_v37 }
  0x4e   :  { %524 = vmatpush1.msra.mxu1 %v2612_v29  ;;  %1946 = vmatmul.mubr.msk.f32.gmra.mxu0 %vm75_vm0, %v2459_v39  ;;  %v55_v39 = vlaneseq }
  0x4f   :  { %525 = vmatprep.subr.mxu1 %v2616_v0  ;;  %620 = vmatpush1.msra.mxu0 %v2452_v38 }
  0x50   :  { %526 = vmatpush1.msra.mxu1 %v2620_v32  ;;  %621 = vmatprep.subr.mxu0 %v2461_v40 }
  0x51   :  { %527 = vmatprep.subr.mxu1 %v2624_v34  ;;  %622 = vmatpush1.msra.mxu0 %v2464_v41 }
  0x52   :  { %528 = vmatpush1.msra.mxu1 %v2628_v33  ;;  %206 = vmatprep.mubr.f32.mxu0 %v3605_v31 }
  0x53   :  { %562 = vmatmul.mubr.f32.vlgmr.msra.gmra.mxu1 %v3605_v31  ;;  %668 = vmatprep.subr.mxu1 %v2501_v49 }
  0x54   :  { %669 = vmatpush1.msra.mxu1 %v2504_v50  ;;  %623 = vmatprep.subr.mxu0 %v2468_v42 }
  0x55   :  { %670 = vmatprep.subr.mxu1 %v2508_v51  ;;  %1947 = vmatmul.mubr.msk.f32.gmra.mxu0 %vm75_vm0, %v2481_v44  ;;  %v56_v44 = vshrl.u32 %v55_v39, 7 }
  0x56   :  { %671 = vmatpush1.msra.mxu1 %v2513_v52  ;;  %624 = vmatpush1.msra.mxu0 %v2474_v43 }
  0x57   :  { %672 = vmatprep.subr.mxu1 %v2516_v53  ;;  %625 = vmatprep.subr.mxu0 %v2483_v45 }
  0x58   :  { %673 = vmatpush1.msra.mxu1 %v2520_v54  ;;  %626 = vmatpush1.msra.mxu0 %v2486_v46 }
  0x59   :  { %674 = vmatprep.subr.mxu1 %v2524_v55  ;;  %627 = vmatprep.subr.mxu0 %v2490_v47  ;;  %v69_v47 = vsub.s32 3, %v56_v44 }
  0x5a   :  { %675 = vmatpush1.msra.mxu1 %v2528_v56  ;;  %628 = vmatpush1.msra.mxu0 %v2497_v48 }
  0x5b   :  { %676 = vmatprep.subr.mxu1 %v2532_v57  ;;  %661 = vmatprep.mubr.f32.mxu0 %v3605_v31 }
  0x5c   :  { %677 = vmatpush1.msra.mxu1 %v2537_v58  ;;  %732 = vmatprep.mubr.f32.mxu1 %v3605_v31  ;;  %v53_v31 = vld [vmem:[%s3484_s3] sm:$0xf] }
  0x5d   :  { %678 = vmatprep.subr.mxu1 %v2541_v59  ;;  %768 = vmatprep.subr.mxu0 %v2328_v6  ;;  %v65_v6 = vsub.s32 2, %v56_v44 }
  0x5e   :  { %679 = vmatpush1.msra.mxu1 %v2545_v60 }
  0x5f   :  { %680 = vmatprep.subr.mxu1 %v2549_v61 }
  0x60   :  { %681 = vmatpush1.msra.mxu1 %v2553_v62 }
  0x61   :  { %682 = vmatprep.subr.mxu1 %v2557_v63 }
  0x62   :  { %683 = vmatpush1.msra.mxu1 %v2562_v1 }
  0x63   :  { %684 = vmatprep.subr.mxu1 %v2566_v2 }
  0x64   :  { %685 = vmatpush1.msra.mxu1 %v2570_v3 }
  0x65   :  { %686 = vmatprep.subr.mxu1 %v2574_v4 }
  0x66   :  { %687 = vmatpush1.msra.mxu1 %v2578_v5 }
  0x67   :  { %688 = vmatprep.subr.mxu1 %v2582_v10 }
  0x68   :  { %689 = vmatpush1.msra.mxu1 %v2587_v15 }
  0x69   :  { %690 = vmatprep.subr.mxu1 %v2591_v19 }
  0x6a   :  { %691 = vmatpush1.msra.mxu1 %v2595_v21 }
  0x6b   :  { %692 = vmatprep.subr.mxu1 %v2599_v22 }
  0x6c   :  { %693 = vmatpush1.msra.mxu1 %v2603_v26 }
  0x6d   :  { %694 = vmatprep.subr.mxu1 %v2607_v28 }
  0x6e   :  { %695 = vmatpush1.msra.mxu1 %v2612_v29 }
  0x6f   :  { %696 = vmatprep.subr.mxu1 %v2616_v0  ;;  %v2692_v0 = vrot.slane %v53_v31, %v65_v6 }
  0x70   :  { %697 = vmatpush1.msra.mxu1 %v2620_v32 }
  0x71   :  { %698 = vmatprep.subr.mxu1 %v2624_v34  ;;  %v2694_v34 = vrot.slane %v53_v31, %v69_v47 }
  0x72   :  { %699 = vmatpush1.msra.mxu1 %v2628_v33 }
  0x73   :  { %839 = vmatprep.subr.mxu1 %v2501_v49 }
  0xd3   :  { %v2688_v48 = vpop.f32.mrf.mxu1 }
  0xd5   :  { %v2690_v46 = vpop.f32.mrf.mxu1 }
  0xd7   :  { %v285_v32 = vpop.f32.mrf.mxu1 }
  0xd8   :  { %v2697_v33 = vadd.f32 %v285_v32, %v2692_v0 }
  0xd9   :  { %v287_v49 = vpop.f32.mrf.mxu1 }
  0xda   :  { %3607 = vst [vmem:[#allocation31_spill] sm:$0xff] %v2697_v33  ;;  %v2700_v39 = vadd.f32 %v287_v49, %v2694_v34 }
  0xdb   :  { %v291_v45 = vpop.f32.mrf.mxu1 }
  0xdc   :  { %3608 = vst [vmem:[#allocation32_spill] sm:$0xff] %v2700_v39  ;;  %v2703_v29 = vadd.f32 %v291_v45, %v2692_v0 }
  0xdd   :  { %v293_v43 = vpop.f32.mrf.mxu1 }
  0xde   :  { %3609 = vst [vmem:[#allocation33_spill] sm:$0xff] %v2703_v29  ;;  %v2706_v28 = vadd.f32 %v293_v43, %v2694_v34 }
  0xdf   :  { %v297_v6 = vpop.f32.mrf.mxu1 }
  0xe0   :  { %3610 = vst [vmem:[#allocation34_spill] sm:$0xff] %v2706_v28  ;;  %v2709_v42 = vadd.f32 %v297_v6, %v2692_v0 }
  0xe1   :  { %v299_v47 = vpop.f32.mrf.mxu1 }
  0xe2   :  { %3611 = vst [vmem:[#allocation35_spill] sm:$0xff] %v2709_v42  ;;  %v2712_v32 = vadd.f32 %v299_v47, %v2694_v34  ;;  %v166_v42 = vpop.f32.mrf.mxu0 }
  0xe3   :  { %v303_v33 = vpop.f32.mrf.mxu1 }
  0xe4   :  { %3612 = vst [vmem:[#allocation36_spill] sm:$0xff] %v2712_v32  ;;  %v2715_v49 = vadd.f32 %v303_v33, %v2692_v0  ;;  %v61_v32 = vsub.s32 1, %v56_v44 }
  0xe5   :  { %v305_v39 = vpop.f32.mrf.mxu1 }
  0xe6   :  { %3613 = vst [vmem:[#allocation37_spill] sm:$0xff] %v2715_v49  ;;  %v2718_v45 = vadd.f32 %v305_v39, %v2694_v34  ;;  %v57_v49 = vsub.s32 0, %v56_v44  ;;  %v168_v39 = vpop.f32.mrf.mxu0 }
  0xe7   :  { %v309_v29 = vpop.f32.mrf.mxu1 }
  0xe8   :  { %3614 = vst [vmem:[#allocation38_spill] sm:$0xff] %v2718_v45  ;;  %v2721_v43 = vadd.f32 %v309_v29, %v2692_v0 }
  0xe9   :  { %v311_v28 = vpop.f32.mrf.mxu1 }
  0xea   :  { %3615 = vst [vmem:[#allocation39_spill] sm:$0xff] %v2721_v43  ;;  %v2724_v6 = vadd.f32 %v311_v28, %v2694_v34  ;;  %v2735_v43 = vrot.slane %v53_v31, %v61_v32  ;;  %v2737_v28 = vpop.f32.mrf.mxu0 }
  0xeb   :  { %v315_v26 = vpop.f32.mrf.mxu1  ;;  %3621 = vst [vmem:[#allocation45_spill] sm:$0xff] %v2737_v28 }
  0xec   :  { %3616 = vst [vmem:[#allocation40_spill] sm:$0xff] %v2724_v6  ;;  %v2727_v47 = vadd.f32 %v315_v26, %v2692_v0  ;;  %3620 = vst [vmem:[#allocation44_spill] sm:$0xff] %v2735_v43  ;;  %v2739_v6 = vrot.slane %v53_v31, %v57_v49  ;;  %v169_v44 = vadd.f32 %v168_v39, %v2735_v43 }
  0xed   :  { %v317_v33 = vpop.f32.mrf.mxu1 }
  0xee   :  { %3617 = vst [vmem:[#allocation41_spill] sm:$0xff] %v2727_v47  ;;  %v2730_v41 = vadd.f32 %v317_v33, %v2694_v34  ;;  %v2745_v33 = vpop.f32.mrf.mxu0 }
  0xef   :  { %v321_v45 = vpop.f32.mrf.mxu1  ;;  %3623 = vst [vmem:[#allocation47_spill] sm:$0xff] %v2745_v33 }
  0xf0   :  { %3618 = vst [vmem:[#allocation42_spill] sm:$0xff] %v2730_v41  ;;  %v2733_v29 = vadd.f32 %v321_v45, %v2692_v0  ;;  %v167_v41 = vadd.f32 %v166_v42, %v2739_v6 }
  0xf1   :  { %v323_v22 = vpop.f32.mrf.mxu1 }
  0xf2   :  { %3619 = vst [vmem:[#allocation43_spill] sm:$0xff] %v2733_v29  ;;  %v2742_v26 = vadd.f32 %v323_v22, %v2694_v34 }
  0xf3   :  { %v492_v47 = vpop.f32.mrf.mxu1 }
  0xf4   :  { %3622 = vst [vmem:[#allocation46_spill] sm:$0xff] %v2742_v26  ;;  %v493_v32 = vadd.f32 %v492_v47, %v167_v41 }
  0xf5   :  { %v494_v40 = vpop.f32.mrf.mxu1 }
  0xf6   :  { %v495_v45 = vadd.f32 %v494_v40, %v169_v44  ;;  %v178_v29 = vpop.f32.mrf.mxu0  ;;  %v1956_v26 = vmul.f32 -1.442695, %v493_v32 }
  0xf7   :  { %v2749_v21 = vadd.f32 %v178_v29, %v2739_v6 }
  0xf8   :  { %v180_v31 = vpop.f32.mrf.mxu0  ;;  %v1957_v22 = vmul.f32 -1.442695, %v495_v45 }
  0xf9   :  { %3624 = vst [vmem:[#allocation48_spill] sm:$0xff] %v2749_v21  ;;  %v2752_v49 = vadd.f32 %v180_v31, %v2735_v43  ;;  %v3654_v21 = vld [vmem:[#allocation19_spill] sm:$0xff] }
  0xfa   :  { %2053 = vpow2.f32 %v1957_v22 }
  0xfb   :  { %3625 = vst [vmem:[#allocation49_spill] sm:$0xff] %v2752_v49  ;;  %2055 = vpow2.f32 %v1956_v26 }
  0xfc   :  { %v184_v28 = vpop.f32.mrf.mxu0 }
  0xfd   :  { %v2755_v39 = vadd.f32 %v184_v28, %v2739_v6 }
  0xfe   :  { %v186_v33 = vpop.f32.mrf.mxu0 }
  0xff   :  { %3626 = vst [vmem:[#allocation50_spill] sm:$0xff] %v2755_v39  ;;  %v2758_v40 = vadd.f32 %v186_v33, %v2735_v43 }
 0x101   :  { %3627 = vst [vmem:[#allocation51_spill] sm:$0xff] %v2758_v40 }
 0x102   :  { %v190_v41 = vpop.f32.mrf.mxu0 }
 0x103   :  { %v2761_v42 = vadd.f32 %v190_v41, %v2739_v6 }
 0x104   :  { %v192_v47 = vpop.f32.mrf.mxu0 }
 0x105   :  { %3628 = vst [vmem:[#allocation52_spill] sm:$0xff] %v2761_v42  ;;  %v2764_v29 = vadd.f32 %v192_v47, %v2735_v43  ;;  %v280_v47 = vadd.f32 %v2688_v48, %v2692_v0 }
 0x107   :  { %3629 = vst [vmem:[#allocation53_spill] sm:$0xff] %v2764_v29  ;;  %v2054_v32 = vpop.eup %2053 }
 0x108   :  { %v196_v44 = vpop.f32.mrf.mxu0  ;;  %v2056_v26 = vpop.eup %2055  ;;  %v577_v33 = vadd.f32 1.0, %v2054_v32 }
 0x109   :  { %v2767_v45 = vadd.f32 %v196_v44, %v2739_v6  ;;  %v571_v40 = vadd.f32 1.0, %v2056_v26 }
 0x10a   :  { %v198_v28 = vpop.f32.mrf.mxu0  ;;  %2057 = vrcp.f32 %v577_v33  ;;  %v3638_v33 = vld [vmem:[#allocation10_spill] sm:$0xff] }
 0x10b   :  { %3630 = vst [vmem:[#allocation54_spill] sm:$0xff] %v2767_v45  ;;  %v2770_v31 = vadd.f32 %v198_v28, %v2735_v43  ;;  %v282_v45 = vadd.f32 %v2690_v46, %v2694_v34  ;;  %2059 = vrcp.f32 %v571_v40 }
 0x10d   :  { %3631 = vst [vmem:[#allocation55_spill] sm:$0xff] %v2770_v31 }
 0x10e   :  { %v202_v22 = vpop.f32.mrf.mxu0 }
 0x10f   :  { %v2773_v41 = vadd.f32 %v202_v22, %v2739_v6 }
 0x110   :  { %v204_v29 = vpop.f32.mrf.mxu0 }
 0x111   :  { %3632 = vst [vmem:[#allocation56_spill] sm:$0xff] %v2773_v41  ;;  %v2778_v44 = vadd.f32 %v204_v29, %v2735_v43 }
 0x113   :  { %v563_v42 = vpop.f32.mrf.mxu1  ;;  %3633 = vst [vmem:[#allocation57_spill] sm:$0xff] %v2778_v44 }
 0x114   :  { %v564_v28 = vadd.f32 %v563_v42, %v280_v47  ;;  %v3639_v47 = vld [vmem:[#allocation22_spill] sm:$0xff] }
 0x115   :  { %v565_v32 = vpop.f32.mrf.mxu1  ;;  %v208_v31 = vpop.f32.mrf.mxu0 }
 0x116   :  { %2061 = vtanh.f32 %v564_v28  ;;  %v566_v26 = vadd.f32 %v565_v32, %v282_v45  ;;  %v2783_v41 = vadd.f32 %v208_v31, %v2739_v6  ;;  %v3637_v31 = vld [vmem:[#allocation9_spill] sm:$0xff]  ;;  %v3641_v28 = vld [vmem:[#allocation23_spill] sm:$0xff] }
 0x117   :  { %v2058_v0 = vpop.eup %2057  ;;  %v3642_v32 = vld [vmem:[#allocation13_spill] sm:$0xff] }
 0x118   :  { %v1958_v22 = vmul.f32 -1.442695, %v566_v26  ;;  %3634 = vst [vmem:[#allocation58_spill] sm:$0xff] %v2783_v41  ;;  %v2060_v48 = vpop.eup %2059  ;;  %v587_v29 = vmul.f32 0.0, %v2058_v0  ;;  %v3643_v26 = vld [vmem:[#allocation24_spill] sm:$0xff]  ;;  %v3645_v0 = vld [vmem:[#allocation25_spill] sm:$0xff] }
 0x119   :  { %v3652_v41 = vld [vmem:[#allocation18_spill] sm:$0xff] }
 0x11a   :  { %2063 = vpow2.f32 %v1958_v22  ;;  %v3644_v22 = vld [vmem:[#allocation14_spill] sm:$0xff] }
 0x123   :  { %v2062_v39 = vpop.eup %2061 }
 0x124   :  { %v588_v44 = vmul.f32 %v2062_v39, %v2060_v48  ;;  %v3636_v39 = vld [vmem:[#allocation8_spill] sm:$0xff]  ;;  %v3646_v48 = vld [vmem:[#allocation15_spill] sm:$0xff] }
 0x126   :  { %v2785_v49 = vadd.f32 %v588_v44, %v587_v29  ;;  %v3640_v44 = vld [vmem:[#allocation12_spill] sm:$0xff]  ;;  %v3647_v29 = vld [vmem:[#allocation26_spill] sm:$0xff] }
 0x127   :  { %v2064_v46 = vpop.eup %2063 }
 0x128   :  { %v584_v34 = vadd.f32 1.0, %v2064_v46  ;;  %2065 = vtanh.f32 %v2785_v49  ;;  %v3648_v46 = vld [vmem:[#allocation16_spill] sm:$0xff] }
 0x12a   :  { %2067 = vrcp.f32 %v584_v34  ;;  %v3649_v34 = vld [vmem:[#allocation27_spill] sm:$0xff] }
 0x135   :  { %v2066_v40 = vpop.eup %2065 }
 0x137   :  { %v2068_v42 = vpop.eup %2067 }
 0x138   :  { %v2788_v45 = vmul.f32 %v2068_v42, %v2066_v40  ;;  %v3650_v40 = vld [vmem:[#allocation17_spill] sm:$0xff]  ;;  %v3651_v42 = vld [vmem:[#allocation28_spill] sm:$0xff] }
 0x13a   :  { %3635 = vst [vmem:[#allocation59_spill] sm:$0xff] %v2788_v45  ;;  %662 = vmatmul.mubr.f32.vlgmr.msra.gmra.mxu0 %v2788_v45  ;;  %733 = vmatmul.mubr.f32.vlgmr.msra.gmra.mxu1 %v2788_v45  ;;  %v3653_v45 = vld [vmem:[#allocation29_spill] sm:$0xff] }
 0x13b   :  { %769 = vmatpush1.msra.mxu0 %v2330_v7  ;;  %840 = vmatpush1.msra.mxu1 %v2504_v50 }
 0x13c   :  { %770 = vmatprep.subr.mxu0 %v2332_v8  ;;  %841 = vmatprep.subr.mxu1 %v2508_v51 }
 0x13d   :  { %771 = vmatpush1.msra.mxu0 %v2337_v9  ;;  %842 = vmatpush1.msra.mxu1 %v2513_v52 }
 0x13e   :  { %772 = vmatprep.subr.mxu0 %v2346_v11  ;;  %843 = vmatprep.subr.mxu1 %v2516_v53 }
 0x13f   :  { %773 = vmatpush1.msra.mxu0 %v2349_v12  ;;  %844 = vmatpush1.msra.mxu1 %v2520_v54 }
 0x140   :  { %774 = vmatprep.subr.mxu0 %v2352_v13  ;;  %845 = vmatprep.subr.mxu1 %v2524_v55 }
 0x141   :  { %775 = vmatpush1.msra.mxu0 %v2357_v14  ;;  %846 = vmatpush1.msra.mxu1 %v2528_v56 }
 0x142   :  { %776 = vmatprep.subr.mxu0 %v2366_v16  ;;  %847 = vmatprep.subr.mxu1 %v2532_v57 }
 0x143   :  { %777 = vmatpush1.msra.mxu0 %v2369_v17  ;;  %848 = vmatpush1.msra.mxu1 %v2537_v58 }
 0x144   :  { %778 = vmatprep.subr.mxu0 %v2372_v18  ;;  %849 = vmatprep.subr.mxu1 %v2541_v59 }
 0x145   :  { %779 = vmatpush1.msra.mxu0 %v2380_v20  ;;  %850 = vmatpush1.msra.mxu1 %v2545_v60 }
 0x146   :  { %780 = vmatprep.subr.mxu0 %v2392_v23  ;;  %851 = vmatprep.subr.mxu1 %v2549_v61 }
 0x147   :  { %781 = vmatpush1.msra.mxu0 %v2395_v24  ;;  %852 = vmatpush1.msra.mxu1 %v2553_v62 }
 0x148   :  { %782 = vmatprep.subr.mxu0 %v2398_v25  ;;  %853 = vmatprep.subr.mxu1 %v2557_v63 }
 0x149   :  { %783 = vmatpush1.msra.mxu0 %v2406_v27  ;;  %854 = vmatpush1.msra.mxu1 %v2562_v1 }
 0x14a   :  { %784 = vmatprep.subr.mxu0 %v2418_v30  ;;  %855 = vmatprep.subr.mxu1 %v2566_v2 }
 0x14b   :  { %785 = vmatpush1.msra.mxu0 %v3636_v39  ;;  %856 = vmatpush1.msra.mxu1 %v2570_v3 }
 0x14c   :  { %786 = vmatprep.subr.mxu0 %v3637_v31  ;;  %857 = vmatprep.subr.mxu1 %v2574_v4 }
 0x14d   :  { %787 = vmatpush1.msra.mxu0 %v3638_v33  ;;  %858 = vmatpush1.msra.mxu1 %v2578_v5 }
 0x14e   :  { %788 = vmatprep.subr.mxu0 %v2438_v35  ;;  %859 = vmatprep.subr.mxu1 %v2582_v10 }
 0x14f   :  { %789 = vmatpush1.msra.mxu0 %v2441_v36  ;;  %860 = vmatpush1.msra.mxu1 %v2587_v15 }
 0x150   :  { %790 = vmatprep.subr.mxu0 %v2446_v37  ;;  %861 = vmatprep.subr.mxu1 %v2591_v19 }
 0x151   :  { %791 = vmatpush1.msra.mxu0 %v2452_v38  ;;  %862 = vmatpush1.msra.mxu1 %v3639_v47  ;;  %v3663_v47 = vld [vmem:[#allocation31_spill] sm:$0xff] }
 0x152   :  { %792 = vmatprep.subr.mxu0 %v3640_v44  ;;  %863 = vmatprep.subr.mxu1 %v3641_v28  ;;  %v3662_v44 = vld [vmem:[#allocation32_spill] sm:$0xff] }
 0x153   :  { %793 = vmatpush1.msra.mxu0 %v3642_v32  ;;  %864 = vmatpush1.msra.mxu1 %v3643_v26 }
 0x154   :  { %794 = vmatprep.subr.mxu0 %v3644_v22  ;;  %865 = vmatprep.subr.mxu1 %v3645_v0  ;;  %v3655_v22 = vmov 0.0   ;;  %v3656_v0 = vld [vmem:[#allocation30_spill] sm:$0xff] }
 0x155   :  { %795 = vmatpush1.msra.mxu0 %v3646_v48  ;;  %866 = vmatpush1.msra.mxu1 %v3647_v29  ;;  %v3657_v29 = vld [vmem:[#allocation7_spill] sm:$0xff] }
 0x156   :  { %796 = vmatprep.subr.mxu0 %v3648_v46  ;;  %867 = vmatprep.subr.mxu1 %v3649_v34  ;;  %v3658_v46 = vld [vmem:[#allocation20_spill] sm:$0xff]  ;;  %v2858_v34 = vpop.f32.mrf.mxu0 }
 0x157   :  { %797 = vmatpush1.msra.mxu0 %v3650_v40  ;;  %868 = vmatpush1.msra.mxu1 %v3651_v42  ;;  %3659 = vst [vmem:[#allocation8_spill] sm:$0xff] %v2858_v34  ;;  %v3660_v42 = vld [vmem:[#allocation45_spill] sm:$0xff] }
 0x158   :  { %798 = vmatprep.subr.mxu0 %v3652_v41  ;;  %869 = vmatprep.subr.mxu1 %v3653_v45  ;;  %v173_v40 = vadd.f32 %v3660_v42, %v2739_v6  ;;  %v3661_v45 = vld [vmem:[#allocation47_spill] sm:$0xff] }
 0x159   :  { %799 = vmatpush1.msra.mxu0 %v3654_v21  ;;  %832 = vmatprep.mubr.f32.mxu0 %v3655_v22  ;;  %v175_v48 = vadd.f32 %v3661_v45, %v2735_v43  ;;  %v3197_v43 = vld [vmem:[#allocation4 + $0x58] sm:$0xff] }
 0x15a   :  { %870 = vmatpush1.msra.mxu1 %v3656_v0  ;;  %903 = vmatprep.mubr.f32.mxu1 %v3655_v22 }
 0x15b   :  { %939 = vmatprep.subr.mxu0 %v3657_v29  ;;  %1010 = vmatprep.subr.mxu1 %v3658_v46 }
 0x1fa   :  { %v663_v41 = vpop.f32.mrf.mxu0  ;;  %v734_v0 = vpop.f32.mrf.mxu1 }
 0x1fb   :  { %v664_v21 = vadd.f32 %v663_v41, %v173_v40  ;;  %v735_v34 = vadd.f32 %v734_v0, %v3663_v47 }
 0x1fc   :  { %v665_v26 = vpop.f32.mrf.mxu0  ;;  %v736_v29 = vpop.f32.mrf.mxu1 }
 0x1fd   :  { %v1959_v32 = vmul.f32 -1.442695, %v664_v21  ;;  %v666_v28 = vadd.f32 %v665_v26, %v175_v48  ;;  %v737_v46 = vadd.f32 %v736_v29, %v3662_v44  ;;  %v3688_v29 = vld [vmem:[#allocation49_spill] sm:$0xff] }
 0x1ff   :  { %2069 = vpow2.f32 %v1959_v32  ;;  %v1960_v22 = vmul.f32 -1.442695, %v666_v28  ;;  %v1961_v38 = vmul.f32 -1.442695, %v737_v46 }
 0x201   :  { %2071 = vpow2.f32 %v1960_v22 }
 0x202   :  { %2073 = vtanh.f32 %v735_v34 }
 0x203   :  { %2075 = vpow2.f32 %v1961_v38  ;;  %v3684_v38 = vld [vmem:[#allocation30_spill] sm:$0xff] }
 0x20c   :  { %v2070_v19 = vpop.eup %2069 }
 0x20d   :  { %v742_v6 = vadd.f32 1.0, %v2070_v19 }
 0x20e   :  { %v2072_v42 = vpop.eup %2071 }
 0x20f   :  { %2077 = vrcp.f32 %v742_v6  ;;  %v748_v41 = vadd.f32 1.0, %v2072_v42  ;;  %v2074_v21 = vpop.eup %2073 }
 0x210   :  { %v2076_v45 = vpop.eup %2075 }
 0x211   :  { %2079 = vrcp.f32 %v748_v41  ;;  %v755_v22 = vadd.f32 1.0, %v2076_v45  ;;  %v3689_v45 = vld [vmem:[#allocation34_spill] sm:$0xff] }
 0x213   :  { %2081 = vrcp.f32 %v755_v22 }
 0x21c   :  { %v2078_v32 = vpop.eup %2077 }
 0x21d   :  { %v759_v26 = vmul.f32 %v2078_v32, %v2074_v21 }
 0x21e   :  { %v2080_v28 = vpop.eup %2079 }
 0x21f   :  { %v758_v48 = vmul.f32 %v2080_v28, %v2785_v49  ;;  %v2938_v49 = vld [vmem:[#allocation4 + $0x1e8] sm:$0xff] }
 0x220   :  { %v2082_v19 = vpop.eup %2081  ;;  %3685 = vst [vmem:[#allocation10_spill] sm:$0xff] %v2938_v49 }
 0x221   :  { %v2867_v44 = vadd.f32 %v759_v26, %v758_v48  ;;  %v3690_v26 = vld [vmem:[#allocation33_spill] sm:$0xff] }
 0x223   :  { %2083 = vtanh.f32 %v2867_v44 }
 0x230   :  { %v2084_v47 = vpop.eup %2083 }
 0x231   :  { %v2870_v0 = vmul.f32 %v2084_v47, %v2082_v19 }
 0x233   :  { %3664 = vst [vmem:[#allocation9_spill] sm:$0xff] %v2870_v0  ;;  %833 = vmatmul.mubr.f32.vlgmr.msra.gmra.mxu0 %v2870_v0  ;;  %904 = vmatmul.mubr.f32.vlgmr.msra.gmra.mxu1 %v2870_v0  ;;  %v3209_v0 = vld [vmem:[#allocation4 + $0x30] sm:$0xff] }
 0x234   :  { %940 = vmatpush1.msra.mxu0 %v2330_v7  ;;  %1011 = vmatpush1.msra.mxu1 %v2504_v50  ;;  %v3665_v7 = vld [vmem:[#allocation21_spill] sm:$0xff] }
 0x235   :  { %941 = vmatprep.subr.mxu0 %v2332_v8  ;;  %1012 = vmatprep.subr.mxu1 %v2508_v51  ;;  %v3666_v8 = vld [vmem:[#allocation11_spill] sm:$0xff] }
 0x236   :  { %942 = vmatpush1.msra.mxu0 %v2337_v9  ;;  %1013 = vmatpush1.msra.mxu1 %v2513_v52  ;;  %v3667_v9 = vld [vmem:[#allocation22_spill] sm:$0xff] }
 0x237   :  { %943 = vmatprep.subr.mxu0 %v2346_v11  ;;  %1014 = vmatprep.subr.mxu1 %v2516_v53  ;;  %v3668_v11 = vld [vmem:[#allocation12_spill] sm:$0xff] }
 0x238   :  { %944 = vmatpush1.msra.mxu0 %v2349_v12  ;;  %1015 = vmatpush1.msra.mxu1 %v2520_v54  ;;  %v3669_v12 = vld [vmem:[#allocation23_spill] sm:$0xff] }
 0x239   :  { %945 = vmatprep.subr.mxu0 %v2352_v13  ;;  %1016 = vmatprep.subr.mxu1 %v2524_v55  ;;  %v3670_v13 = vld [vmem:[#allocation13_spill] sm:$0xff] }
 0x23a   :  { %946 = vmatpush1.msra.mxu0 %v2357_v14  ;;  %1017 = vmatpush1.msra.mxu1 %v2528_v56  ;;  %v3671_v14 = vld [vmem:[#allocation24_spill] sm:$0xff] }
 0x23b   :  { %947 = vmatprep.subr.mxu0 %v2366_v16  ;;  %1018 = vmatprep.subr.mxu1 %v2532_v57  ;;  %v3672_v16 = vld [vmem:[#allocation14_spill] sm:$0xff] }
 0x23c   :  { %948 = vmatpush1.msra.mxu0 %v2369_v17  ;;  %1019 = vmatpush1.msra.mxu1 %v2537_v58  ;;  %v3673_v17 = vld [vmem:[#allocation25_spill] sm:$0xff] }
 0x23d   :  { %949 = vmatprep.subr.mxu0 %v2372_v18  ;;  %1020 = vmatprep.subr.mxu1 %v2541_v59  ;;  %v3674_v18 = vld [vmem:[#allocation15_spill] sm:$0xff] }
 0x23e   :  { %950 = vmatpush1.msra.mxu0 %v2380_v20  ;;  %1021 = vmatpush1.msra.mxu1 %v2545_v60  ;;  %v3675_v20 = vld [vmem:[#allocation26_spill] sm:$0xff]  ;;  %3709 = vst [vmem:[#allocation15_spill] sm:$0xff] %v3197_v43 }
 0x23f   :  { %951 = vmatprep.subr.mxu0 %v2392_v23  ;;  %1022 = vmatprep.subr.mxu1 %v2549_v61  ;;  %v3676_v23 = vld [vmem:[#allocation16_spill] sm:$0xff] }
 0x240   :  { %952 = vmatpush1.msra.mxu0 %v2395_v24  ;;  %1023 = vmatpush1.msra.mxu1 %v2553_v62  ;;  %v3677_v24 = vld [vmem:[#allocation27_spill] sm:$0xff] }
 0x241   :  { %953 = vmatprep.subr.mxu0 %v2398_v25  ;;  %1024 = vmatprep.subr.mxu1 %v2557_v63  ;;  %v3678_v25 = vld [vmem:[#allocation17_spill] sm:$0xff]  ;;  %3712 = vst [vmem:[#allocation27_spill] sm:$0xff] %v3209_v0 }
 0x242   :  { %954 = vmatpush1.msra.mxu0 %v2406_v27  ;;  %1025 = vmatpush1.msra.mxu1 %v2562_v1  ;;  %v3679_v27 = vld [vmem:[#allocation28_spill] sm:$0xff] }
 0x243   :  { %955 = vmatprep.subr.mxu0 %v2418_v30  ;;  %1026 = vmatprep.subr.mxu1 %v2566_v2  ;;  %v3680_v30 = vld [vmem:[#allocation18_spill] sm:$0xff] }
 0x244   :  { %956 = vmatpush1.msra.mxu0 %v3636_v39  ;;  %1027 = vmatpush1.msra.mxu1 %v2570_v3  ;;  %v3686_v39 = vld [vmem:[#allocation20_spill] sm:$0xff] }
 0x245   :  { %957 = vmatprep.subr.mxu0 %v3637_v31  ;;  %1028 = vmatprep.subr.mxu1 %v2574_v4 }
 0x246   :  { %958 = vmatpush1.msra.mxu0 %v3638_v33  ;;  %1029 = vmatpush1.msra.mxu1 %v2578_v5  ;;  %v3687_v33 = vld [vmem:[#allocation48_spill] sm:$0xff] }
 0x247   :  { %959 = vmatprep.subr.mxu0 %v2438_v35  ;;  %1030 = vmatprep.subr.mxu1 %v2582_v10  ;;  %v3681_v35 = vld [vmem:[#allocation29_spill] sm:$0xff] }
 0x248   :  { %960 = vmatpush1.msra.mxu0 %v2441_v36  ;;  %1031 = vmatpush1.msra.mxu1 %v2587_v15  ;;  %v3682_v36 = vld [vmem:[#allocation19_spill] sm:$0xff] }
 0x249   :  { %961 = vmatprep.subr.mxu0 %v2446_v37  ;;  %1032 = vmatprep.subr.mxu1 %v3665_v7  ;;  %v3683_v37 = vmov 0.0  }
 0x24a   :  { %962 = vmatpush1.msra.mxu0 %v3666_v8  ;;  %1033 = vmatpush1.msra.mxu1 %v3667_v9 }
 0x24b   :  { %963 = vmatprep.subr.mxu0 %v3668_v11  ;;  %1034 = vmatprep.subr.mxu1 %v3669_v12 }
 0x24c   :  { %964 = vmatpush1.msra.mxu0 %v3670_v13  ;;  %1035 = vmatpush1.msra.mxu1 %v3671_v14 }
 0x24d   :  { %965 = vmatprep.subr.mxu0 %v3672_v16  ;;  %1036 = vmatprep.subr.mxu1 %v3673_v17 }
 0x24e   :  { %966 = vmatpush1.msra.mxu0 %v3674_v18  ;;  %1037 = vmatpush1.msra.mxu1 %v3675_v20 }
 0x24f   :  { %967 = vmatprep.subr.mxu0 %v3676_v23  ;;  %1038 = vmatprep.subr.mxu1 %v3677_v24 }
 0x250   :  { %968 = vmatpush1.msra.mxu0 %v3678_v25  ;;  %1039 = vmatpush1.msra.mxu1 %v3679_v27 }
 0x251   :  { %969 = vmatprep.subr.mxu0 %v3680_v30  ;;  %1040 = vmatprep.subr.mxu1 %v3681_v35 }
 0x252   :  { %970 = vmatpush1.msra.mxu0 %v3682_v36  ;;  %1003 = vmatprep.mubr.f32.mxu0 %v3683_v37 }
 0x253   :  { %1041 = vmatpush1.msra.mxu1 %v3684_v38  ;;  %1074 = vmatprep.mubr.f32.mxu1 %v3683_v37 }
 0x254   :  { %1110 = vmatprep.subr.mxu0 %v2938_v49  ;;  %1181 = vmatprep.subr.mxu1 %v3686_v39 }
 0x2f3   :  { %v834_v31 = vpop.f32.mrf.mxu0  ;;  %v905_v42 = vpop.f32.mrf.mxu1 }
 0x2f4   :  { %v835_v46 = vadd.f32 %v834_v31, %v3687_v33  ;;  %v906_v28 = vadd.f32 %v905_v42, %v3690_v26  ;;  %v3703_v26 = vld [vmem:[#allocation36_spill] sm:$0xff] }
 0x2f5   :  { %v836_v34 = vpop.f32.mrf.mxu0  ;;  %v907_v21 = vpop.f32.mrf.mxu1 }
 0x2f6   :  { %v1962_v40 = vmul.f32 -1.442695, %v835_v46  ;;  %v837_v6 = vadd.f32 %v836_v34, %v3688_v29  ;;  %v908_v32 = vadd.f32 %v907_v21, %v3689_v45  ;;  %v2954_v46 = vld [vmem:[#allocation4 + $0x1e0] sm:$0xff] }
 0x2f7   :  { %v2962_v34 = vld [vmem:[#allocation4 + $0x1c0] sm:$0xff] }
 0x2f8   :  { %2085 = vpow2.f32 %v1962_v40  ;;  %v1963_v41 = vmul.f32 -1.442695, %v837_v6  ;;  %v1964_v22 = vmul.f32 -1.442695, %v908_v32  ;;  %v2966_v40 = vld [vmem:[#allocation4 + $0x1a8] sm:$0xff]  ;;  %v2970_v29 = vld [vmem:[#allocation4 + $0x1a0] sm:$0xff] }
 0x2fa   :  { %2087 = vpow2.f32 %v1963_v41  ;;  %v3702_v41 = vld [vmem:[#allocation51_spill] sm:$0xff] }
 0x2fb   :  { %2089 = vtanh.f32 %v906_v28 }
 0x2fc   :  { %2091 = vpow2.f32 %v1964_v22  ;;  %v3704_v22 = vld [vmem:[#allocation35_spill] sm:$0xff] }
 0x305   :  { %v2086_v48 = vpop.eup %2085 }
 0x306   :  { %v913_v19 = vadd.f32 1.0, %v2086_v48 }
 0x307   :  { %v2088_v47 = vpop.eup %2087 }
 0x308   :  { %2093 = vrcp.f32 %v913_v19  ;;  %v919_v8 = vadd.f32 1.0, %v2088_v47  ;;  %v2090_v11 = vpop.eup %2089 }
 0x309   :  { %v2092_v13 = vpop.eup %2091 }
 0x30a   :  { %2095 = vrcp.f32 %v919_v8  ;;  %v926_v25 = vadd.f32 1.0, %v2092_v13 }
 0x30c   :  { %2097 = vrcp.f32 %v926_v25 }
 0x315   :  { %v2094_v16 = vpop.eup %2093 }
 0x316   :  { %v930_v18 = vmul.f32 %v2094_v16, %v2090_v11 }
 0x317   :  { %v2096_v23 = vpop.eup %2095 }
 0x318   :  { %v929_v30 = vmul.f32 %v2096_v23, %v2867_v44  ;;  %v2958_v44 = vld [vmem:[#allocation4 + $0x1c8] sm:$0xff] }
 0x319   :  { %v2098_v39 = vpop.eup %2097 }
 0x31a   :  { %v2947_v36 = vadd.f32 %v930_v18, %v929_v30 }
 0x31c   :  { %2099 = vtanh.f32 %v2947_v36 }
 0x329   :  { %v2100_v31 = vpop.eup %2099 }
 0x32a   :  { %v2950_v33 = vmul.f32 %v2100_v31, %v2098_v39 }
 0x32c   :  { %3691 = vst [vmem:[#allocation7_spill] sm:$0xff] %v2950_v33  ;;  %1004 = vmatmul.mubr.f32.vlgmr.msra.gmra.mxu0 %v2950_v33  ;;  %1075 = vmatmul.mubr.f32.vlgmr.msra.gmra.mxu1 %v2950_v33  ;;  %v3205_v33 = vld [vmem:[#allocation4 + $0x38] sm:$0xff] }
 0x32d   :  { %1111 = vmatpush1.msra.mxu0 %v2954_v46  ;;  %1182 = vmatpush1.msra.mxu1 %v2504_v50  ;;  %v2974_v50 = vld [vmem:[#allocation4 + $0x188] sm:$0xff]  ;;  %3711 = vst [vmem:[#allocation16_spill] sm:$0xff] %v3205_v33 }
 0x32e   :  { %1112 = vmatprep.subr.mxu0 %v2958_v44  ;;  %1183 = vmatprep.subr.mxu1 %v2508_v51  ;;  %v2978_v51 = vld [vmem:[#allocation4 + $0x180] sm:$0xff] }
 0x32f   :  { %1113 = vmatpush1.msra.mxu0 %v2962_v34  ;;  %1184 = vmatpush1.msra.mxu1 %v2513_v52  ;;  %v2982_v52 = vld [vmem:[#allocation4 + $0x168] sm:$0xff] }
 0x330   :  { %1114 = vmatprep.subr.mxu0 %v2966_v40  ;;  %1185 = vmatprep.subr.mxu1 %v2516_v53  ;;  %v2986_v53 = vld [vmem:[#allocation4 + $0x160] sm:$0xff] }
 0x331   :  { %1115 = vmatpush1.msra.mxu0 %v2970_v29  ;;  %1186 = vmatpush1.msra.mxu1 %v2520_v54  ;;  %v2990_v54 = vld [vmem:[#allocation4 + $0x148] sm:$0xff] }
 0x332   :  { %1116 = vmatprep.subr.mxu0 %v2974_v50  ;;  %1187 = vmatprep.subr.mxu1 %v2524_v55  ;;  %v2994_v55 = vld [vmem:[#allocation4 + $0x140] sm:$0xff] }
 0x333   :  { %1117 = vmatpush1.msra.mxu0 %v2978_v51  ;;  %1188 = vmatpush1.msra.mxu1 %v2528_v56  ;;  %v2998_v56 = vld [vmem:[#allocation4 + $0x128] sm:$0xff] }
 0x334   :  { %1118 = vmatprep.subr.mxu0 %v2982_v52  ;;  %1189 = vmatprep.subr.mxu1 %v2532_v57  ;;  %v3002_v57 = vld [vmem:[#allocation4 + $0x120] sm:$0xff] }
 0x335   :  { %1119 = vmatpush1.msra.mxu0 %v2986_v53  ;;  %1190 = vmatpush1.msra.mxu1 %v2537_v58  ;;  %v3006_v58 = vld [vmem:[#allocation4 + $0x108] sm:$0xff] }
 0x336   :  { %1120 = vmatprep.subr.mxu0 %v2990_v54  ;;  %1191 = vmatprep.subr.mxu1 %v2541_v59  ;;  %v3010_v59 = vld [vmem:[#allocation4 + $0x100] sm:$0xff] }
 0x337   :  { %1121 = vmatpush1.msra.mxu0 %v2994_v55  ;;  %1192 = vmatpush1.msra.mxu1 %v2545_v60  ;;  %v3014_v60 = vld [vmem:[#allocation4 + $0xe8] sm:$0xff] }
 0x338   :  { %1122 = vmatprep.subr.mxu0 %v2998_v56  ;;  %1193 = vmatprep.subr.mxu1 %v2549_v61  ;;  %v3018_v61 = vld [vmem:[#allocation4 + $0xe0] sm:$0xff] }
 0x339   :  { %1123 = vmatpush1.msra.mxu0 %v3002_v57  ;;  %1194 = vmatpush1.msra.mxu1 %v2553_v62  ;;  %v3022_v62 = vld [vmem:[#allocation4 + $0xc8] sm:$0xff] }
 0x33a   :  { %1124 = vmatprep.subr.mxu0 %v3006_v58  ;;  %1195 = vmatprep.subr.mxu1 %v2557_v63  ;;  %v3026_v63 = vld [vmem:[#allocation4 + $0xc0] sm:$0xff] }
 0x33b   :  { %1125 = vmatpush1.msra.mxu0 %v3010_v59  ;;  %1196 = vmatpush1.msra.mxu1 %v2562_v1  ;;  %v3030_v1 = vld [vmem:[#allocation4 + $0xa8] sm:$0xff] }
 0x33c   :  { %1126 = vmatprep.subr.mxu0 %v3014_v60  ;;  %1197 = vmatprep.subr.mxu1 %v2566_v2  ;;  %v3034_v2 = vld [vmem:[#allocation4 + $0xa0] sm:$0xff] }
 0x33d   :  { %1127 = vmatpush1.msra.mxu0 %v3018_v61  ;;  %1198 = vmatpush1.msra.mxu1 %v2570_v3  ;;  %v3038_v3 = vld [vmem:[#allocation4 + $0x88] sm:$0xff] }
 0x33e   :  { %1128 = vmatprep.subr.mxu0 %v3022_v62  ;;  %1199 = vmatprep.subr.mxu1 %v2574_v4  ;;  %v3042_v4 = vld [vmem:[#allocation4 + $0x80] sm:$0xff] }
 0x33f   :  { %1129 = vmatpush1.msra.mxu0 %v3026_v63  ;;  %1200 = vmatpush1.msra.mxu1 %v2578_v5  ;;  %v3046_v5 = vld [vmem:[#allocation4 + $0x68] sm:$0xff] }
 0x340   :  { %1130 = vmatprep.subr.mxu0 %v3030_v1  ;;  %1201 = vmatprep.subr.mxu1 %v2582_v10  ;;  %3692 = vst [vmem:[#allocation45_spill] sm:$0xff] %v3046_v5  ;;  %v3050_v10 = vld [vmem:[#allocation4 + $0x60] sm:$0xff] }
 0x341   :  { %1131 = vmatpush1.msra.mxu0 %v3034_v2  ;;  %1202 = vmatpush1.msra.mxu1 %v2587_v15  ;;  %3693 = vst [vmem:[#allocation47_spill] sm:$0xff] %v3050_v10  ;;  %v3054_v15 = vld [vmem:[#allocation4 + $0x48] sm:$0xff] }
 0x342   :  { %1132 = vmatprep.subr.mxu0 %v3038_v3  ;;  %1203 = vmatprep.subr.mxu1 %v3665_v7  ;;  %3694 = vst [vmem:[#allocation32_spill] sm:$0xff] %v3054_v15  ;;  %v3058_v7 = vld [vmem:[#allocation4 + $0x40] sm:$0xff] }
 0x343   :  { %1133 = vmatpush1.msra.mxu0 %v3042_v4  ;;  %1204 = vmatpush1.msra.mxu1 %v3667_v9  ;;  %3695 = vst [vmem:[#allocation31_spill] sm:$0xff] %v3058_v7  ;;  %v3062_v9 = vld [vmem:[#allocation4 + $0x28] sm:$0xff] }
 0x344   :  { %1134 = vmatprep.subr.mxu0 %v3046_v5  ;;  %1205 = vmatprep.subr.mxu1 %v3669_v12  ;;  %3696 = vst [vmem:[#allocation21_spill] sm:$0xff] %v3062_v9  ;;  %v3066_v12 = vld [vmem:[#allocation4 + $0x20] sm:$0xff] }
 0x345   :  { %1135 = vmatpush1.msra.mxu0 %v3050_v10  ;;  %1206 = vmatpush1.msra.mxu1 %v3671_v14  ;;  %3697 = vst [vmem:[#allocation11_spill] sm:$0xff] %v3066_v12  ;;  %v3070_v14 = vld [vmem:[#allocation4 + $0x8] sm:$0xff] }
 0x346   :  { %1136 = vmatprep.subr.mxu0 %v3054_v15  ;;  %1207 = vmatprep.subr.mxu1 %v3673_v17  ;;  %3698 = vst [vmem:[#allocation22_spill] sm:$0xff] %v3070_v14  ;;  %v3074_v17 = vld [vmem:[#allocation4] sm:$0xff] }
 0x347   :  { %1137 = vmatpush1.msra.mxu0 %v3058_v7  ;;  %1208 = vmatpush1.msra.mxu1 %v3675_v20  ;;  %3699 = vst [vmem:[#allocation12_spill] sm:$0xff] %v3074_v17  ;;  %v3081_v20 = vld [vmem:[#allocation4 + $0x1f8] sm:$0xff] }
 0x348   :  { %1138 = vmatprep.subr.mxu0 %v3062_v9  ;;  %1209 = vmatprep.subr.mxu1 %v3677_v24  ;;  %3700 = vst [vmem:[#allocation23_spill] sm:$0xff] %v3081_v20 }
 0x349   :  { %1139 = vmatpush1.msra.mxu0 %v3066_v12  ;;  %1210 = vmatpush1.msra.mxu1 %v3679_v27  ;;  %v3701_v27 = vld [vmem:[#allocation50_spill] sm:$0xff] }
 0x34a   :  { %1140 = vmatprep.subr.mxu0 %v3070_v14  ;;  %1211 = vmatprep.subr.mxu1 %v3681_v35 }
 0x34b   :  { %1141 = vmatpush1.msra.mxu0 %v3074_v17  ;;  %1174 = vmatprep.mubr.f32.mxu0 %v3683_v37 }
 0x34c   :  { %1212 = vmatpush1.msra.mxu1 %v3684_v38  ;;  %1245 = vmatprep.mubr.f32.mxu1 %v3683_v37 }
 0x34d   :  { %1281 = vmatprep.subr.mxu0 %v2938_v49  ;;  %1352 = vmatprep.subr.mxu1 %v3081_v20 }
 0x3ec   :  { %v1005_v24 = vpop.f32.mrf.mxu0  ;;  %v1076_v45 = vpop.f32.mrf.mxu1 }
 0x3ed   :  { %v1006_v6 = vadd.f32 %v1005_v24, %v3701_v27  ;;  %v1077_v48 = vadd.f32 %v1076_v45, %v3704_v22  ;;  %v3113_v45 = vld [vmem:[#allocation4 + $0x1b0] sm:$0xff]  ;;  %v3133_v22 = vld [vmem:[#allocation4 + $0x158] sm:$0xff] }
 0x3ee   :  { %v1007_v35 = vpop.f32.mrf.mxu0  ;;  %v1078_v38 = vpop.f32.mrf.mxu1 }
 0x3ef   :  { %v1965_v42 = vmul.f32 -1.442695, %v1006_v6  ;;  %v1008_v21 = vadd.f32 %v1007_v35, %v3702_v41  ;;  %v1079_v28 = vadd.f32 %v1078_v38, %v3703_v26  ;;  %v3105_v41 = vld [vmem:[#allocation4 + $0x1d0] sm:$0xff]  ;;  %v3125_v26 = vld [vmem:[#allocation4 + $0x178] sm:$0xff] }
 0x3f0   :  { %v3121_v38 = vld [vmem:[#allocation4 + $0x190] sm:$0xff] }
 0x3f1   :  { %2101 = vpow2.f32 %v1965_v42  ;;  %v1966_v32 = vmul.f32 -1.442695, %v1008_v21  ;;  %v1967_v19 = vmul.f32 -1.442695, %v1079_v28  ;;  %v3097_v42 = vld [vmem:[#allocation4 + $0x1f0] sm:$0xff]  ;;  %v3109_v21 = vld [vmem:[#allocation4 + $0x1b8] sm:$0xff] }
 0x3f2   :  { %v3129_v28 = vld [vmem:[#allocation4 + $0x170] sm:$0xff] }
 0x3f3   :  { %2103 = vpow2.f32 %v1966_v32  ;;  %v3117_v32 = vld [vmem:[#allocation4 + $0x198] sm:$0xff] }
 0x3f4   :  { %2105 = vtanh.f32 %v1077_v48  ;;  %v3137_v48 = vld [vmem:[#allocation4 + $0x150] sm:$0xff] }
 0x3f5   :  { %2107 = vpow2.f32 %v1967_v19  ;;  %v3141_v19 = vld [vmem:[#allocation4 + $0x138] sm:$0xff] }
 0x3fe   :  { %v2102_v47 = vpop.eup %2101 }
 0x3ff   :  { %v1084_v8 = vadd.f32 1.0, %v2102_v47  ;;  %v3145_v47 = vld [vmem:[#allocation4 + $0x130] sm:$0xff] }
 0x400   :  { %v2104_v11 = vpop.eup %2103 }
 0x401   :  { %2109 = vrcp.f32 %v1084_v8  ;;  %v1090_v13 = vadd.f32 1.0, %v2104_v11  ;;  %v2106_v16 = vpop.eup %2105  ;;  %v3149_v8 = vld [vmem:[#allocation4 + $0x118] sm:$0xff]  ;;  %v3153_v11 = vld [vmem:[#allocation4 + $0x110] sm:$0xff] }
 0x402   :  { %v2108_v18 = vpop.eup %2107 }
 0x403   :  { %2111 = vrcp.f32 %v1090_v13  ;;  %v1097_v39 = vadd.f32 1.0, %v2108_v18  ;;  %v3157_v13 = vld [vmem:[#allocation4 + $0xf8] sm:$0xff] }
 0x404   :  { %v3165_v18 = vld [vmem:[#allocation4 + $0xd8] sm:$0xff] }
 0x405   :  { %2113 = vrcp.f32 %v1097_v39  ;;  %v3181_v39 = vld [vmem:[#allocation4 + $0x98] sm:$0xff] }
 0x40e   :  { %v2110_v23 = vpop.eup %2109 }
 0x40f   :  { %v1101_v25 = vmul.f32 %v2110_v23, %v2106_v16  ;;  %v3161_v16 = vld [vmem:[#allocation4 + $0xf0] sm:$0xff] }
 0x410   :  { %v2112_v30 = vpop.eup %2111  ;;  %v3169_v23 = vld [vmem:[#allocation4 + $0xd0] sm:$0xff] }
 0x411   :  { %v1100_v31 = vmul.f32 %v2112_v30, %v2947_v36  ;;  %v3101_v36 = vld [vmem:[#allocation4 + $0x1d8] sm:$0xff]  ;;  %v3177_v30 = vld [vmem:[#allocation4 + $0xb0] sm:$0xff] }
 0x412   :  { %v2114_v27 = vpop.eup %2113 }
 0x413   :  { %v3089_v24 = vadd.f32 %v1101_v25, %v1100_v31  ;;  %v3173_v25 = vld [vmem:[#allocation4 + $0xb8] sm:$0xff]  ;;  %v3185_v31 = vld [vmem:[#allocation4 + $0x90] sm:$0xff] }
 0x414   :  { %3706 = vst [vmem:[#allocation24_spill] sm:$0xff] %v3185_v31 }
 0x415   :  { %2115 = vtanh.f32 %v3089_v24 }
 0x422   :  { %v2116_v6 = vpop.eup %2115 }
 0x423   :  { %v3092_v35 = vmul.f32 %v2116_v6, %v2114_v27  ;;  %v3189_v27 = vld [vmem:[#allocation4 + $0x78] sm:$0xff]  ;;  %v3193_v6 = vld [vmem:[#allocation4 + $0x70] sm:$0xff] }
 0x424   :  { %3707 = vst [vmem:[#allocation14_spill] sm:$0xff] %v3189_v27  ;;  %3708 = vst [vmem:[#allocation25_spill] sm:$0xff] %v3193_v6 }
 0x425   :  { %3705 = vst [vmem:[#allocation13_spill] sm:$0xff] %v3092_v35  ;;  %1175 = vmatmul.mubr.f32.vlgmr.msra.gmra.mxu0 %v3092_v35  ;;  %1246 = vmatmul.mubr.f32.vlgmr.msra.gmra.mxu1 %v3092_v35  ;;  %v3201_v35 = vld [vmem:[#allocation4 + $0x50] sm:$0xff] }
 0x426   :  { %1282 = vmatpush1.msra.mxu0 %v2954_v46  ;;  %1353 = vmatpush1.msra.mxu1 %v3097_v42  ;;  %3710 = vst [vmem:[#allocation26_spill] sm:$0xff] %v3201_v35 }
 0x427   :  { %1283 = vmatprep.subr.mxu0 %v2958_v44  ;;  %1354 = vmatprep.subr.mxu1 %v3101_v36 }
 0x428   :  { %1284 = vmatpush1.msra.mxu0 %v2962_v34  ;;  %1355 = vmatpush1.msra.mxu1 %v3105_v41 }
 0x429   :  { %1285 = vmatprep.subr.mxu0 %v2966_v40  ;;  %1356 = vmatprep.subr.mxu1 %v3109_v21 }
 0x42a   :  { %1286 = vmatpush1.msra.mxu0 %v2970_v29  ;;  %1357 = vmatpush1.msra.mxu1 %v3113_v45 }
 0x42b   :  { %1287 = vmatprep.subr.mxu0 %v2974_v50  ;;  %1358 = vmatprep.subr.mxu1 %v3117_v32 }
 0x42c   :  { %1288 = vmatpush1.msra.mxu0 %v2978_v51  ;;  %1359 = vmatpush1.msra.mxu1 %v3121_v38 }
 0x42d   :  { %1289 = vmatprep.subr.mxu0 %v2982_v52  ;;  %1360 = vmatprep.subr.mxu1 %v3125_v26 }
 0x42e   :  { %1290 = vmatpush1.msra.mxu0 %v2986_v53  ;;  %1361 = vmatpush1.msra.mxu1 %v3129_v28 }
 0x42f   :  { %1291 = vmatprep.subr.mxu0 %v2990_v54  ;;  %1362 = vmatprep.subr.mxu1 %v3133_v22 }
 0x430   :  { %1292 = vmatpush1.msra.mxu0 %v2994_v55  ;;  %1363 = vmatpush1.msra.mxu1 %v3137_v48 }
 0x431   :  { %1293 = vmatprep.subr.mxu0 %v2998_v56  ;;  %1364 = vmatprep.subr.mxu1 %v3141_v19 }
 0x432   :  { %1294 = vmatpush1.msra.mxu0 %v3002_v57  ;;  %1365 = vmatpush1.msra.mxu1 %v3145_v47 }
 0x433   :  { %1295 = vmatprep.subr.mxu0 %v3006_v58  ;;  %1366 = vmatprep.subr.mxu1 %v3149_v8 }
 0x434   :  { %1296 = vmatpush1.msra.mxu0 %v3010_v59  ;;  %1367 = vmatpush1.msra.mxu1 %v3153_v11 }
 0x435   :  { %1297 = vmatprep.subr.mxu0 %v3014_v60  ;;  %1368 = vmatprep.subr.mxu1 %v3157_v13 }
 0x436   :  { %1298 = vmatpush1.msra.mxu0 %v3018_v61  ;;  %1369 = vmatpush1.msra.mxu1 %v3161_v16 }
 0x437   :  { %1299 = vmatprep.subr.mxu0 %v3022_v62  ;;  %1370 = vmatprep.subr.mxu1 %v3165_v18 }
 0x438   :  { %1300 = vmatpush1.msra.mxu0 %v3026_v63  ;;  %1371 = vmatpush1.msra.mxu1 %v3169_v23 }
 0x439   :  { %1301 = vmatprep.subr.mxu0 %v3030_v1  ;;  %1372 = vmatprep.subr.mxu1 %v3173_v25 }
 0x43a   :  { %1302 = vmatpush1.msra.mxu0 %v3034_v2  ;;  %1373 = vmatpush1.msra.mxu1 %v3177_v30 }
 0x43b   :  { %1303 = vmatprep.subr.mxu0 %v3038_v3  ;;  %1374 = vmatprep.subr.mxu1 %v3181_v39 }
 0x43c   :  { %1304 = vmatpush1.msra.mxu0 %v3042_v4  ;;  %1375 = vmatpush1.msra.mxu1 %v3185_v31 }
 0x43d   :  { %1305 = vmatprep.subr.mxu0 %v3046_v5  ;;  %1376 = vmatprep.subr.mxu1 %v3189_v27  ;;  %v3718_v27 = vld [vmem:[#allocation37_spill] sm:$0xff] }
 0x43e   :  { %1306 = vmatpush1.msra.mxu0 %v3050_v10  ;;  %1377 = vmatpush1.msra.mxu1 %v3193_v6  ;;  %v3717_v10 = vld [vmem:[#allocation38_spill] sm:$0xff] }
 0x43f   :  { %1307 = vmatprep.subr.mxu0 %v3054_v15  ;;  %1378 = vmatprep.subr.mxu1 %v3197_v43  ;;  %v3213_v43 = vld [vmem:[#allocation4 + $0x18] sm:$0xff] }
 0x440   :  { %1308 = vmatpush1.msra.mxu0 %v3058_v7  ;;  %1379 = vmatpush1.msra.mxu1 %v3201_v35  ;;  %3713 = vst [vmem:[#allocation17_spill] sm:$0xff] %v3213_v43 }
 0x441   :  { %1309 = vmatprep.subr.mxu0 %v3062_v9  ;;  %1380 = vmatprep.subr.mxu1 %v3205_v33  ;;  %v3218_v9 = vld [vmem:[#allocation4 + $0x10] sm:$0xff] }
 0x442   :  { %1310 = vmatpush1.msra.mxu0 %v3066_v12  ;;  %1381 = vmatpush1.msra.mxu1 %v3209_v0  ;;  %3714 = vst [vmem:[#allocation28_spill] sm:$0xff] %v3218_v9 }
 0x443   :  { %1311 = vmatprep.subr.mxu0 %v3070_v14  ;;  %1382 = vmatprep.subr.mxu1 %v3213_v43  ;;  %v3715_v14 = vld [vmem:[#allocation52_spill] sm:$0xff]  ;;  %v3716_v43 = vld [vmem:[#allocation53_spill] sm:$0xff] }
 0x444   :  { %1312 = vmatpush1.msra.mxu0 %v3074_v17  ;;  %1345 = vmatprep.mubr.f32.mxu0 %v3683_v37 }
 0x445   :  { %1383 = vmatpush1.msra.mxu1 %v3218_v9  ;;  %1416 = vmatprep.mubr.f32.mxu1 %v3683_v37 }
 0x446   :  { %1452 = vmatprep.subr.mxu0 %v2938_v49  ;;  %1523 = vmatprep.subr.mxu1 %v3081_v20 }
 0x4e5   :  { %v1176_v0 = vpop.f32.mrf.mxu0  ;;  %v1247_v17 = vpop.f32.mrf.mxu1 }
 0x4e6   :  { %v1177_v12 = vadd.f32 %v1176_v0, %v3715_v14  ;;  %v1248_v37 = vadd.f32 %v1247_v17, %v3718_v27  ;;  %v3721_v17 = vld [vmem:[#allocation45_spill] sm:$0xff]  ;;  %v3725_v27 = vld [vmem:[#allocation32_spill] sm:$0xff] }
 0x4e7   :  { %v1178_v33 = vpop.f32.mrf.mxu0  ;;  %v1249_v6 = vpop.f32.mrf.mxu1 }
 0x4e8   :  { %v1968_v35 = vmul.f32 -1.442695, %v1177_v12  ;;  %v1179_v7 = vadd.f32 %v1178_v33, %v3716_v43  ;;  %v1250_v9 = vadd.f32 %v1249_v6, %v3717_v10  ;;  %v3726_v6 = vld [vmem:[#allocation15_spill] sm:$0xff] }
 0x4ea   :  { %2117 = vpow2.f32 %v1968_v35  ;;  %v1969_v15 = vmul.f32 -1.442695, %v1179_v7  ;;  %v1970_v5 = vmul.f32 -1.442695, %v1250_v9 }
 0x4ec   :  { %2119 = vpow2.f32 %v1969_v15 }
 0x4ed   :  { %2121 = vtanh.f32 %v1248_v37 }
 0x4ee   :  { %2123 = vpow2.f32 %v1970_v5  ;;  %v3720_v5 = vld [vmem:[#allocation24_spill] sm:$0xff] }
 0x4f7   :  { %v2118_v49 = vpop.eup %2117 }
 0x4f8   :  { %v1255_v31 = vadd.f32 1.0, %v2118_v49 }
 0x4f9   :  { %v2120_v20 = vpop.eup %2119 }
 0x4fa   :  { %2125 = vrcp.f32 %v1255_v31  ;;  %v1261_v0 = vadd.f32 1.0, %v2120_v20  ;;  %v2122_v12 = vpop.eup %2121  ;;  %v3722_v20 = vld [vmem:[#allocation14_spill] sm:$0xff]  ;;  %v3724_v31 = vld [vmem:[#allocation25_spill] sm:$0xff] }
 0x4fb   :  { %v2124_v43 = vpop.eup %2123 }
 0x4fc   :  { %2127 = vrcp.f32 %v1261_v0  ;;  %v1268_v15 = vadd.f32 1.0, %v2124_v43  ;;  %v3727_v0 = vld [vmem:[#allocation31_spill] sm:$0xff]  ;;  %v3729_v43 = vld [vmem:[#allocation21_spill] sm:$0xff] }
 0x4fe   :  { %2129 = vrcp.f32 %v1268_v15  ;;  %v3733_v15 = vld [vmem:[#allocation22_spill] sm:$0xff] }
 0x507   :  { %v2126_v33 = vpop.eup %2125 }
 0x508   :  { %v1272_v14 = vmul.f32 %v2126_v33, %v2122_v12  ;;  %v3728_v12 = vld [vmem:[#allocation26_spill] sm:$0xff]  ;;  %v3730_v33 = vld [vmem:[#allocation16_spill] sm:$0xff] }
 0x509   :  { %v2128_v7 = vpop.eup %2127 }
 0x50a   :  { %v1271_v35 = vmul.f32 %v2128_v7, %v3089_v24  ;;  %v3723_v24 = vld [vmem:[#allocation47_spill] sm:$0xff] }
 0x50b   :  { %v2130_v49 = vpop.eup %2129  ;;  %v3732_v7 = vld [vmem:[#allocation27_spill] sm:$0xff] }
 0x50c   :  { %v3229_v10 = vadd.f32 %v1272_v14, %v1271_v35  ;;  %v3731_v14 = vld [vmem:[#allocation11_spill] sm:$0xff]  ;;  %v3734_v35 = vld [vmem:[#allocation17_spill] sm:$0xff] }
 0x50e   :  { %2131 = vtanh.f32 %v3229_v10 }
 0x51b   :  { %v2132_v37 = vpop.eup %2131 }
 0x51c   :  { %v3232_v9 = vmul.f32 %v2132_v37, %v2130_v49  ;;  %v3735_v49 = vld [vmem:[#allocation12_spill] sm:$0xff]  ;;  %v3736_v37 = vmov 0.0  }
 0x51e   :  { %3719 = vst [vmem:[#allocation18_spill] sm:$0xff] %v3232_v9  ;;  %1346 = vmatmul.mubr.f32.vlgmr.msra.gmra.mxu0 %v3232_v9  ;;  %1417 = vmatmul.mubr.f32.vlgmr.msra.gmra.mxu1 %v3232_v9  ;;  %v3737_v9 = vld [vmem:[#allocation28_spill] sm:$0xff] }
 0x51f   :  { %1453 = vmatpush1.msra.mxu0 %v2954_v46  ;;  %1524 = vmatpush1.msra.mxu1 %v3097_v42 }
 0x520   :  { %1454 = vmatprep.subr.mxu0 %v2958_v44  ;;  %1525 = vmatprep.subr.mxu1 %v3101_v36 }
 0x521   :  { %1455 = vmatpush1.msra.mxu0 %v2962_v34  ;;  %1526 = vmatpush1.msra.mxu1 %v3105_v41 }
 0x522   :  { %1456 = vmatprep.subr.mxu0 %v2966_v40  ;;  %1527 = vmatprep.subr.mxu1 %v3109_v21 }
 0x523   :  { %1457 = vmatpush1.msra.mxu0 %v2970_v29  ;;  %1528 = vmatpush1.msra.mxu1 %v3113_v45 }
 0x524   :  { %1458 = vmatprep.subr.mxu0 %v2974_v50  ;;  %1529 = vmatprep.subr.mxu1 %v3117_v32 }
 0x525   :  { %1459 = vmatpush1.msra.mxu0 %v2978_v51  ;;  %1530 = vmatpush1.msra.mxu1 %v3121_v38 }
 0x526   :  { %1460 = vmatprep.subr.mxu0 %v2982_v52  ;;  %1531 = vmatprep.subr.mxu1 %v3125_v26 }
 0x527   :  { %1461 = vmatpush1.msra.mxu0 %v2986_v53  ;;  %1532 = vmatpush1.msra.mxu1 %v3129_v28 }
 0x528   :  { %1462 = vmatprep.subr.mxu0 %v2990_v54  ;;  %1533 = vmatprep.subr.mxu1 %v3133_v22 }
 0x529   :  { %1463 = vmatpush1.msra.mxu0 %v2994_v55  ;;  %1534 = vmatpush1.msra.mxu1 %v3137_v48 }
 0x52a   :  { %1464 = vmatprep.subr.mxu0 %v2998_v56  ;;  %1535 = vmatprep.subr.mxu1 %v3141_v19 }
 0x52b   :  { %1465 = vmatpush1.msra.mxu0 %v3002_v57  ;;  %1536 = vmatpush1.msra.mxu1 %v3145_v47 }
 0x52c   :  { %1466 = vmatprep.subr.mxu0 %v3006_v58  ;;  %1537 = vmatprep.subr.mxu1 %v3149_v8 }
 0x52d   :  { %1467 = vmatpush1.msra.mxu0 %v3010_v59  ;;  %1538 = vmatpush1.msra.mxu1 %v3153_v11 }
 0x52e   :  { %1468 = vmatprep.subr.mxu0 %v3014_v60  ;;  %1539 = vmatprep.subr.mxu1 %v3157_v13 }
 0x52f   :  { %1469 = vmatpush1.msra.mxu0 %v3018_v61  ;;  %1540 = vmatpush1.msra.mxu1 %v3161_v16 }
 0x530   :  { %1470 = vmatprep.subr.mxu0 %v3022_v62  ;;  %1541 = vmatprep.subr.mxu1 %v3165_v18 }
 0x531   :  { %1471 = vmatpush1.msra.mxu0 %v3026_v63  ;;  %1542 = vmatpush1.msra.mxu1 %v3169_v23 }
 0x532   :  { %1472 = vmatprep.subr.mxu0 %v3030_v1  ;;  %1543 = vmatprep.subr.mxu1 %v3173_v25 }
 0x533   :  { %1473 = vmatpush1.msra.mxu0 %v3034_v2  ;;  %1544 = vmatpush1.msra.mxu1 %v3177_v30 }
 0x534   :  { %1474 = vmatprep.subr.mxu0 %v3038_v3  ;;  %1545 = vmatprep.subr.mxu1 %v3181_v39 }
 0x535   :  { %1475 = vmatpush1.msra.mxu0 %v3042_v4  ;;  %1546 = vmatpush1.msra.mxu1 %v3720_v5 }
 0x536   :  { %1476 = vmatprep.subr.mxu0 %v3721_v17  ;;  %1547 = vmatprep.subr.mxu1 %v3722_v20  ;;  %v3743_v20 = vld [vmem:[#allocation39_spill] sm:$0xff] }
 0x537   :  { %1477 = vmatpush1.msra.mxu0 %v3723_v24  ;;  %1548 = vmatpush1.msra.mxu1 %v3724_v31  ;;  %v3742_v24 = vld [vmem:[#allocation40_spill] sm:$0xff] }
 0x538   :  { %1478 = vmatprep.subr.mxu0 %v3725_v27  ;;  %1549 = vmatprep.subr.mxu1 %v3726_v6 }
 0x539   :  { %1479 = vmatpush1.msra.mxu0 %v3727_v0  ;;  %1550 = vmatpush1.msra.mxu1 %v3728_v12  ;;  %v3738_v12 = vld [vmem:[#allocation10_spill] sm:$0xff] }
 0x53a   :  { %1480 = vmatprep.subr.mxu0 %v3729_v43  ;;  %1551 = vmatprep.subr.mxu1 %v3730_v33  ;;  %v3739_v43 = vld [vmem:[#allocation23_spill] sm:$0xff] }
 0x53b   :  { %1481 = vmatpush1.msra.mxu0 %v3731_v14  ;;  %1552 = vmatpush1.msra.mxu1 %v3732_v7  ;;  %v3740_v14 = vld [vmem:[#allocation54_spill] sm:$0xff] }
 0x53c   :  { %1482 = vmatprep.subr.mxu0 %v3733_v15  ;;  %1553 = vmatprep.subr.mxu1 %v3734_v35  ;;  %v3741_v15 = vld [vmem:[#allocation55_spill] sm:$0xff] }
 0x53d   :  { %1483 = vmatpush1.msra.mxu0 %v3735_v49  ;;  %1516 = vmatprep.mubr.f32.mxu0 %v3736_v37 }
 0x53e   :  { %1554 = vmatpush1.msra.mxu1 %v3737_v9  ;;  %1587 = vmatprep.mubr.f32.mxu1 %v3736_v37 }
 0x53f   :  { %1623 = vmatprep.subr.mxu0 %v3738_v12  ;;  %1694 = vmatprep.subr.mxu1 %v3739_v43 }
 0x5de   :  { %v1347_v33 = vpop.f32.mrf.mxu0  ;;  %v1418_v35 = vpop.f32.mrf.mxu1 }
 0x5df   :  { %v1348_v0 = vadd.f32 %v1347_v33, %v3740_v14  ;;  %v1419_v37 = vadd.f32 %v1418_v35, %v3743_v20 }
 0x5e0   :  { %v1349_v7 = vpop.f32.mrf.mxu0  ;;  %v1420_v31 = vpop.f32.mrf.mxu1 }
 0x5e1   :  { %v1971_v6 = vmul.f32 -1.442695, %v1348_v0  ;;  %v1350_v27 = vadd.f32 %v1349_v7, %v3741_v15  ;;  %v1421_v9 = vadd.f32 %v1420_v31, %v3742_v24 }
 0x5e3   :  { %2133 = vpow2.f32 %v1971_v6  ;;  %v1972_v49 = vmul.f32 -1.442695, %v1350_v27  ;;  %v1973_v17 = vmul.f32 -1.442695, %v1421_v9 }
 0x5e5   :  { %2135 = vpow2.f32 %v1972_v49 }
 0x5e6   :  { %2137 = vtanh.f32 %v1419_v37  ;;  %v1812_v37 = vld [vmem:[%s3485_s4 + $0x70] sm:$0xff] }
 0x5e7   :  { %2139 = vpow2.f32 %v1973_v17 }
 0x5f0   :  { %v2134_v12 = vpop.eup %2133 }
 0x5f1   :  { %v1426_v5 = vadd.f32 1.0, %v2134_v12  ;;  %v3766_v12 = vld [vmem:[#allocation59_spill] sm:$0xff] }
 0x5f2   :  { %v2136_v43 = vpop.eup %2135 }
 0x5f3   :  { %2141 = vrcp.f32 %v1426_v5  ;;  %v1432_v33 = vadd.f32 1.0, %v2136_v43  ;;  %v2138_v0 = vpop.eup %2137  ;;  %v1811_v43 = vld [vmem:[%s3485_s4 + $0x68] sm:$0xff] }
 0x5f4   :  { %v2140_v14 = vpop.eup %2139 }
 0x5f5   :  { %2143 = vrcp.f32 %v1432_v33  ;;  %v1439_v15 = vadd.f32 1.0, %v2140_v14  ;;  %v1810_v33 = vld [vmem:[%s3485_s4 + $0x60] sm:$0xff]  ;;  %v1808_v14 = vld [vmem:[%s3485_s4 + $0x50] sm:$0xff] }
 0x5f7   :  { %2145 = vrcp.f32 %v1439_v15  ;;  %v1804_v15 = vld [vmem:[%s3485_s4 + $0x30] sm:$0xff] }
 0x600   :  { %v2142_v6 = vpop.eup %2141 }
 0x601   :  { %v1443_v7 = vmul.f32 %v2142_v6, %v2138_v0  ;;  %v1809_v0 = vld [vmem:[%s3485_s4 + $0x58] sm:$0xff]  ;;  %v1807_v6 = vld [vmem:[%s3485_s4 + $0x48] sm:$0xff] }
 0x602   :  { %v2144_v27 = vpop.eup %2143 }
 0x603   :  { %v1442_v49 = vmul.f32 %v2144_v27, %v3229_v10  ;;  %v1805_v27 = vld [vmem:[%s3485_s4 + $0x38] sm:$0xff] }
 0x604   :  { %v2146_v9 = vpop.eup %2145 }
 0x605   :  { %v3307_v24 = vadd.f32 %v1443_v7, %v1442_v49  ;;  %v1806_v7 = vld [vmem:[%s3485_s4 + $0x40] sm:$0xff]  ;;  %v1803_v49 = vld [vmem:[%s3485_s4 + $0x28] sm:$0xff] }
 0x607   :  { %2147 = vtanh.f32 %v3307_v24 }
 0x614   :  { %v2148_v20 = vpop.eup %2147 }
 0x615   :  { %v3310_v31 = vmul.f32 %v2148_v20, %v2146_v9  ;;  %v1801_v9 = vld [vmem:[%s3485_s4 + $0x18] sm:$0xff]  ;;  %v1800_v20 = vld [vmem:[%s3485_s4 + $0x10] sm:$0xff] }
 0x617   :  { %1517 = vmatmul.mubr.f32.vlgmr.msra.gmra.mxu0 %v3310_v31  ;;  %1588 = vmatmul.mubr.f32.vlgmr.msra.gmra.mxu1 %v3310_v31 }
 0x618   :  { %1624 = vmatpush1.msra.mxu0 %v2954_v46  ;;  %1695 = vmatpush1.msra.mxu1 %v3097_v42  ;;  %v3744_v46 = vld [vmem:[#allocation24_spill] sm:$0xff] }
 0x619   :  { %1625 = vmatprep.subr.mxu0 %v2958_v44  ;;  %1696 = vmatprep.subr.mxu1 %v3101_v36  ;;  %v3745_v44 = vld [vmem:[#allocation45_spill] sm:$0xff] }
 0x61a   :  { %1626 = vmatpush1.msra.mxu0 %v2962_v34  ;;  %1697 = vmatpush1.msra.mxu1 %v3105_v41  ;;  %v3746_v34 = vld [vmem:[#allocation14_spill] sm:$0xff]  ;;  %v3763_v36 = vld [vmem:[#allocation57_spill] sm:$0xff] }
 0x61b   :  { %1627 = vmatprep.subr.mxu0 %v2966_v40  ;;  %1698 = vmatprep.subr.mxu1 %v3109_v21  ;;  %v3747_v40 = vld [vmem:[#allocation47_spill] sm:$0xff] }
 0x61c   :  { %1628 = vmatpush1.msra.mxu0 %v2970_v29  ;;  %1699 = vmatpush1.msra.mxu1 %v3113_v45  ;;  %v3748_v29 = vld [vmem:[#allocation25_spill] sm:$0xff] }
 0x61d   :  { %1629 = vmatprep.subr.mxu0 %v2974_v50  ;;  %1700 = vmatprep.subr.mxu1 %v3117_v32  ;;  %v3749_v50 = vld [vmem:[#allocation32_spill] sm:$0xff] }
 0x61e   :  { %1630 = vmatpush1.msra.mxu0 %v2978_v51  ;;  %1701 = vmatpush1.msra.mxu1 %v3121_v38  ;;  %v3750_v51 = vld [vmem:[#allocation15_spill] sm:$0xff]  ;;  %v3764_v38 = vld [vmem:[#allocation42_spill] sm:$0xff] }
 0x61f   :  { %1631 = vmatprep.subr.mxu0 %v2982_v52  ;;  %1702 = vmatprep.subr.mxu1 %v3125_v26  ;;  %v3751_v52 = vld [vmem:[#allocation31_spill] sm:$0xff] }
 0x620   :  { %1632 = vmatpush1.msra.mxu0 %v2986_v53  ;;  %1703 = vmatpush1.msra.mxu1 %v3129_v28  ;;  %v3752_v53 = vld [vmem:[#allocation26_spill] sm:$0xff]  ;;  %v3765_v28 = vld [vmem:[#allocation41_spill] sm:$0xff] }
 0x621   :  { %1633 = vmatprep.subr.mxu0 %v2990_v54  ;;  %1704 = vmatprep.subr.mxu1 %v3133_v22  ;;  %v3753_v54 = vld [vmem:[#allocation21_spill] sm:$0xff] }
 0x622   :  { %1634 = vmatpush1.msra.mxu0 %v2994_v55  ;;  %1705 = vmatpush1.msra.mxu1 %v3137_v48  ;;  %v3754_v55 = vld [vmem:[#allocation16_spill] sm:$0xff] }
 0x623   :  { %1635 = vmatprep.subr.mxu0 %v2998_v56  ;;  %1706 = vmatprep.subr.mxu1 %v3141_v19  ;;  %v3755_v56 = vld [vmem:[#allocation11_spill] sm:$0xff] }
 0x624   :  { %1636 = vmatpush1.msra.mxu0 %v3002_v57  ;;  %1707 = vmatpush1.msra.mxu1 %v3145_v47  ;;  %v3756_v57 = vld [vmem:[#allocation27_spill] sm:$0xff] }
 0x625   :  { %1637 = vmatprep.subr.mxu0 %v3006_v58  ;;  %1708 = vmatprep.subr.mxu1 %v3149_v8  ;;  %v3757_v58 = vld [vmem:[#allocation22_spill] sm:$0xff] }
 0x626   :  { %1638 = vmatpush1.msra.mxu0 %v3010_v59  ;;  %1709 = vmatpush1.msra.mxu1 %v3153_v11  ;;  %v3758_v59 = vld [vmem:[#allocation17_spill] sm:$0xff] }
 0x627   :  { %1639 = vmatprep.subr.mxu0 %v3014_v60  ;;  %1710 = vmatprep.subr.mxu1 %v3157_v13  ;;  %v3759_v60 = vld [vmem:[#allocation12_spill] sm:$0xff] }
 0x628   :  { %1640 = vmatpush1.msra.mxu0 %v3018_v61  ;;  %1711 = vmatpush1.msra.mxu1 %v3161_v16  ;;  %v3760_v61 = vmov 0.0  }
 0x629   :  { %1641 = vmatprep.subr.mxu0 %v3022_v62  ;;  %1712 = vmatprep.subr.mxu1 %v3165_v18  ;;  %v3761_v62 = vld [vmem:[#allocation28_spill] sm:$0xff] }
 0x62a   :  { %1642 = vmatpush1.msra.mxu0 %v3026_v63  ;;  %1713 = vmatpush1.msra.mxu1 %v3169_v23  ;;  %v1813_v63 = vld [vmem:[%s3485_s4 + $0x78] sm:$0xff] }
 0x62b   :  { %1643 = vmatprep.subr.mxu0 %v3030_v1  ;;  %1714 = vmatprep.subr.mxu1 %v3173_v25 }
 0x62c   :  { %1644 = vmatpush1.msra.mxu0 %v3034_v2  ;;  %1715 = vmatpush1.msra.mxu1 %v3177_v30  ;;  %v3762_v2 = vld [vmem:[#allocation56_spill] sm:$0xff] }
 0x62d   :  { %1645 = vmatprep.subr.mxu0 %v3038_v3  ;;  %1716 = vmatprep.subr.mxu1 %v3181_v39 }
 0x62e   :  { %1646 = vmatpush1.msra.mxu0 %v3042_v4  ;;  %1717 = vmatpush1.msra.mxu1 %v3744_v46  ;;  %v1799_v46 = vld [vmem:[%s3485_s4 + $0x8] sm:$0xff] }
 0x62f   :  { %1647 = vmatprep.subr.mxu0 %v3745_v44  ;;  %1718 = vmatprep.subr.mxu1 %v3746_v34  ;;  %v1798_v44 = vld [vmem:[%s3485_s4] sm:$0xff]  ;;  %v3767_v34 = vld [vmem:[#allocation9_spill] sm:$0xff] }
 0x630   :  { %1648 = vmatpush1.msra.mxu0 %v3747_v40  ;;  %1719 = vmatpush1.msra.mxu1 %v3748_v29  ;;  %v3768_v40 = vld [vmem:[#allocation7_spill] sm:$0xff]  ;;  %v3769_v29 = vld [vmem:[#allocation13_spill] sm:$0xff] }
 0x631   :  { %1649 = vmatprep.subr.mxu0 %v3749_v50  ;;  %1720 = vmatprep.subr.mxu1 %v3750_v51  ;;  %v3770_v50 = vld [vmem:[#allocation18_spill] sm:$0xff] }
 0x632   :  { %1650 = vmatpush1.msra.mxu0 %v3751_v52  ;;  %1721 = vmatpush1.msra.mxu1 %v3752_v53  ;;  %v3771_v52 = vld [vmem:[#allocation44_spill] sm:$0xff] }
 0x633   :  { %1651 = vmatprep.subr.mxu0 %v3753_v54  ;;  %1722 = vmatprep.subr.mxu1 %v3754_v55  ;;  %v3772_v53 = vld [vmem:[#allocation8_spill] sm:$0xff]  ;;  %v3773_v55 = vld [vmem:[#allocation58_spill] sm:$0xff] }
 0x634   :  { %1652 = vmatpush1.msra.mxu0 %v3755_v56  ;;  %1723 = vmatpush1.msra.mxu1 %v3756_v57  ;;  %v211_v54 = vadd.f32 %v3772_v53, %v3771_v52 }
 0x635   :  { %1653 = vmatprep.subr.mxu0 %v3757_v58  ;;  %1724 = vmatprep.subr.mxu1 %v3758_v59 }
 0x636   :  { %1654 = vmatpush1.msra.mxu0 %v3759_v60  ;;  %1687 = vmatprep.mubr.f32.mxu0 %v3760_v61 }
 0x637   :  { %1725 = vmatpush1.msra.mxu1 %v3761_v62  ;;  %1758 = vmatprep.mubr.f32.mxu1 %v3760_v61 }
 0x638   :  { %2005 = vmatprep.subr.mxu0 %v1813_v63 }
 0x6d7   :  { %v1518_v1 = vpop.f32.mrf.mxu0  ;;  %v1589_v21 = vpop.f32.mrf.mxu1 }
 0x6d8   :  { %v1519_v3 = vadd.f32 %v1518_v1, %v3762_v2  ;;  %v1590_v22 = vadd.f32 %v1589_v21, %v3765_v28  ;;  %v3775_v2 = vld [vmem:[#allocation43_spill] sm:$0xff] }
 0x6d9   :  { %v1520_v4 = vpop.f32.mrf.mxu0  ;;  %v1591_v32 = vpop.f32.mrf.mxu1  ;;  %v1980_v21 = vld [vmem:[%s3486_s5] ss:$0 sm:$0xff] }
 0x6da   :  { %v1974_v42 = vmul.f32 -1.442695, %v1519_v3  ;;  %v1521_v41 = vadd.f32 %v1520_v4, %v3763_v36  ;;  %v1592_v26 = vadd.f32 %v1591_v32, %v3764_v38 }
 0x6dc   :  { %2149 = vpow2.f32 %v1974_v42  ;;  %v1975_v45 = vmul.f32 -1.442695, %v1521_v41  ;;  %v1976_v48 = vmul.f32 -1.442695, %v1592_v26 }
 0x6de   :  { %2151 = vpow2.f32 %v1975_v45 }
 0x6df   :  { %2153 = vtanh.f32 %v1590_v22 }
 0x6e0   :  { %2155 = vpow2.f32 %v1976_v48 }
 0x6e9   :  { %v2150_v19 = vpop.eup %2149 }
 0x6ea   :  { %v1597_v47 = vadd.f32 1.0, %v2150_v19 }
 0x6eb   :  { %v2152_v8 = vpop.eup %2151 }
 0x6ec   :  { %2157 = vrcp.f32 %v1597_v47  ;;  %v1603_v11 = vadd.f32 1.0, %v2152_v8  ;;  %v2154_v13 = vpop.eup %2153 }
 0x6ed   :  { %v2156_v16 = vpop.eup %2155 }
 0x6ee   :  { %2159 = vrcp.f32 %v1603_v11  ;;  %v1610_v30 = vadd.f32 1.0, %v2156_v16 }
 0x6f0   :  { %2161 = vrcp.f32 %v1610_v30 }
 0x6f9   :  { %v2158_v18 = vpop.eup %2157 }
 0x6fa   :  { %v1614_v23 = vmul.f32 %v2158_v18, %v2154_v13 }
 0x6fb   :  { %v2160_v25 = vpop.eup %2159 }
 0x6fc   :  { %v1613_v39 = vmul.f32 %v2160_v25, %v3307_v24  ;;  %v1802_v24 = vld [vmem:[%s3485_s4 + $0x20] sm:$0xff] }
 0x6fd   :  { %v2162_v5 = vpop.eup %2161 }
 0x6fe   :  { %v3386_v10 = vadd.f32 %v1614_v23, %v1613_v39 }
 0x700   :  { %2163 = vtanh.f32 %v3386_v10 }
 0x70d   :  { %v2164_v17 = vpop.eup %2163 }
 0x70e   :  { %v1617_v35 = vmul.f32 %v2164_v17, %v2162_v5 }
 0x710   :  { %1688 = vmatmul.mubr.f32.vlgmr.msra.gmra.mxu0 %v1617_v35  ;;  %1759 = vmatmul.mubr.f32.vlgmr.msra.gmra.mxu1 %v1617_v35 }
 0x711   :  { %2006 = vmatpush3.msra.mxu0 %v1813_v63  ;;  %2037 = vmatprep.mubr.f32.mxu0 %v3766_v12  ;;  %v3774_v63 = vld [vmem:[#allocation46_spill] sm:$0xff] }
 0x712   :  { %2007 = vmatprep.subr.mxu0 %v1812_v37 }
 0x713   :  { %2008 = vmatpush3.msra.mxu0 %v1812_v37 }
 0x714   :  { %2009 = vmatprep.subr.mxu0 %v1811_v43 }
 0x715   :  { %2010 = vmatpush3.msra.mxu0 %v1811_v43 }
 0x716   :  { %2011 = vmatprep.subr.mxu0 %v1810_v33 }
 0x717   :  { %2012 = vmatpush3.msra.mxu0 %v1810_v33 }
 0x718   :  { %2013 = vmatprep.subr.mxu0 %v1809_v0 }
 0x719   :  { %2014 = vmatpush3.msra.mxu0 %v1809_v0 }
 0x71a   :  { %2015 = vmatprep.subr.mxu0 %v1808_v14 }
 0x71b   :  { %2016 = vmatpush3.msra.mxu0 %v1808_v14 }
 0x71c   :  { %2017 = vmatprep.subr.mxu0 %v1807_v6 }
 0x71d   :  { %2018 = vmatpush3.msra.mxu0 %v1807_v6 }
 0x71e   :  { %2019 = vmatprep.subr.mxu0 %v1806_v7 }
 0x71f   :  { %2020 = vmatpush3.msra.mxu0 %v1806_v7 }
 0x720   :  { %2021 = vmatprep.subr.mxu0 %v1805_v27 }
 0x721   :  { %2022 = vmatpush3.msra.mxu0 %v1805_v27 }
 0x722   :  { %2023 = vmatprep.subr.mxu0 %v1804_v15 }
 0x723   :  { %2024 = vmatpush3.msra.mxu0 %v1804_v15 }
 0x724   :  { %2025 = vmatprep.subr.mxu0 %v1803_v49 }
 0x725   :  { %2026 = vmatpush3.msra.mxu0 %v1803_v49 }
 0x726   :  { %2027 = vmatprep.subr.mxu0 %v1802_v24 }
 0x727   :  { %2028 = vmatpush3.msra.mxu0 %v1802_v24 }
 0x728   :  { %2029 = vmatprep.subr.mxu0 %v1801_v9 }
 0x729   :  { %2030 = vmatpush3.msra.mxu0 %v1801_v9 }
 0x72a   :  { %2031 = vmatprep.subr.mxu0 %v1800_v20 }
 0x72b   :  { %2032 = vmatpush3.msra.mxu0 %v1800_v20 }
 0x72c   :  { %2033 = vmatprep.subr.mxu0 %v1799_v46 }
 0x72d   :  { %2034 = vmatpush3.msra.mxu0 %v1799_v46 }
 0x72e   :  { %2035 = vmatprep.subr.mxu0 %v1798_v44 }
 0x72f   :  { %2036 = vmatpush3.msra.mxu0 %v1798_v44 }
 0x730   :  { %2038 = vmatmul.mubr.f32.vlgmr.msra.gmra.mxu0 %v3767_v34 }
 0x731   :  { %2040 = vmatprep.mubr.f32.mxu0 %v3768_v40 }
 0x734   :  { %2041 = vmatmul.mubr.f32.gmra.mxu0 %v3769_v29 }
 0x735   :  { %2043 = vmatprep.mubr.f32.mxu0 %v3770_v50 }
 0x738   :  { %2044 = vmatmul.mubr.f32.gmra.mxu0 %v3310_v31 }
 0x739   :  { %2046 = vmatprep.mubr.f32.mxu0 %v1617_v35 }
 0x7d0   :  { %v1689_v51 = vpop.f32.mrf.mxu0  ;;  %v1760_v60 = vpop.f32.mrf.mxu1 }
 0x7d1   :  { %v1690_v56 = vadd.f32 %v1689_v51, %v3773_v55  ;;  %v1761_v3 = vadd.f32 %v1760_v60, %v3775_v2 }
 0x7d2   :  { %v1691_v57 = vpop.f32.mrf.mxu0  ;;  %v1762_v62 = vpop.f32.mrf.mxu1 }
 0x7d3   :  { %v1977_v58 = vmul.f32 -1.442695, %v1690_v56  ;;  %v1692_v59 = vadd.f32 %v1691_v57, %v211_v54  ;;  %v1763_v1 = vadd.f32 %v1762_v62, %v3774_v63 }
 0x7d5   :  { %2165 = vpow2.f32 %v1977_v58  ;;  %v1978_v61 = vmul.f32 -1.442695, %v1692_v59  ;;  %v1979_v31 = vmul.f32 -1.442695, %v1763_v1 }
 0x7d7   :  { %2167 = vpow2.f32 %v1978_v61 }
 0x7d8   :  { %2169 = vtanh.f32 %v1761_v3 }
 0x7d9   :  { %2171 = vpow2.f32 %v1979_v31 }
 0x7e2   :  { %v2166_v4 = vpop.eup %2165 }
 0x7e3   :  { %v1768_v42 = vadd.f32 1.0, %v2166_v4 }
 0x7e4   :  { %v2168_v36 = vpop.eup %2167 }
 0x7e5   :  { %2173 = vrcp.f32 %v1768_v42  ;;  %v1774_v41 = vadd.f32 1.0, %v2168_v36  ;;  %v2170_v45 = vpop.eup %2169 }
 0x7e6   :  { %v2172_v38 = vpop.eup %2171 }
 0x7e7   :  { %2175 = vrcp.f32 %v1774_v41  ;;  %v1781_v8 = vadd.f32 1.0, %v2172_v38 }
 0x7e9   :  { %2177 = vrcp.f32 %v1781_v8 }
 0x7f0   :  { %v2039_v32 = vpop.f32.mrf.mxu0 }
 0x7f1   :  { %v1893_v26 = vadd.f32 %v2039_v32, %v1980_v21 }
 0x7f2   :  { %v2174_v28 = vpop.eup %2173  ;;  %v1887_v22 = vpop.f32.mrf.mxu0 }
 0x7f3   :  { %v1785_v48 = vmul.f32 %v2174_v28, %v2170_v45  ;;  %1928 = vst.msk [vmem:[%s3487_s6 + $0x8] sm:$0xff] %vm1926_vm1, %v1893_v26  ;;  %v1888_v19 = vadd.f32 %v1980_v21, %v1887_v22 }
 0x7f4   :  { %v2176_v47 = vpop.eup %2175  ;;  %v2042_v11 = vpop.f32.mrf.mxu0 }
 0x7f5   :  { %v1784_v13 = vmul.f32 %v2176_v47, %v3386_v10  ;;  %1927 = vst.msk [vmem:[%s3487_s6] sm:$0xff] %vm1926_vm1, %v1888_v19  ;;  %v1903_v16 = vadd.f32 %v2042_v11, %v1980_v21 }
 0x7f6   :  { %v1897_v18 = vpop.f32.mrf.mxu0  ;;  %v2178_v17 = vpop.eup %2177 }
 0x7f7   :  { %1930 = vst.msk [vmem:[%s3487_s6 + $0x18] sm:$0xff] %vm1926_vm1, %v1903_v16  ;;  %v1898_v23 = vadd.f32 %v1980_v21, %v1897_v18  ;;  %v1786_v25 = vadd.f32 %v1785_v48, %v1784_v13 }
 0x7f8   :  { %v2045_v30 = vpop.f32.mrf.mxu0 }
 0x7f9   :  { %1929 = vst.msk [vmem:[%s3487_s6 + $0x10] sm:$0xff] %vm1926_vm1, %v1898_v23  ;;  %v1913_v39 = vadd.f32 %v2045_v30, %v1980_v21  ;;  %2179 = vtanh.f32 %v1786_v25 }
 0x7fa   :  { %v1907_v10 = vpop.f32.mrf.mxu0 }
 0x7fb   :  { %1932 = vst.msk [vmem:[%s3487_s6 + $0x28] sm:$0xff] %vm1926_vm1, %v1913_v39  ;;  %v1908_v5 = vadd.f32 %v1980_v21, %v1907_v10 }
 0x7fd   :  { %1931 = vst.msk [vmem:[%s3487_s6 + $0x20] sm:$0xff] %vm1926_vm1, %v1908_v5 }
 0x806   :  { %v2180_v35 = vpop.eup %2179 }
 0x807   :  { %v1788_v37 = vmul.f32 %v2180_v35, %v2178_v17 }
 0x809   :  { %2047 = vmatmul.mubr.f32.gmra.mxu0 %v1788_v37 }
 0x8c9   :  { %v2048_v12 = vpop.f32.mrf.mxu0 }
 0x8ca   :  { %v1923_v43 = vadd.f32 %v2048_v12, %v1980_v21 }
 0x8cb   :  { %v1917_v33 = vpop.f32.mrf.mxu0 }
 0x8cc   :  { %1934 = vst.msk [vmem:[%s3487_s6 + $0x38] sm:$0xff] %vm1926_vm1, %v1923_v43  ;;  %v1918_v0 = vadd.f32 %v1980_v21, %v1917_v33 }
 0x8ce   :  { %1933 = vst.msk [vmem:[%s3487_s6 + $0x30] sm:$0xff] %vm1926_vm1, %v1918_v0 }
 0x8cf   :  { %1939 = vsyncpa [#allocation5], 1 }

</bundles_post_ra>
